<compile_context>
chip_gen: v6e
topology: v6e:2x2x1
jax: 0.10.0
libtpu: 0.0.40
codegen_flags: <defaults>
</compile_context>

<pallas_src>
import jax
import jax.numpy as jnp
from jax.experimental import pallas as pl
from jax.experimental.pallas import tpu as pltpu

# ----------------------- synthetic config (small) --------------------------
NUM_USERS = 10
NUM_ITEMS = 12
EMB       = 32            # conf.embedding_dim
EMB_HALF  = EMB // 2
VOCAB     = 64            # conf.vocab_sz
WORD_DIM  = 32            # conf.word_dimension (== hidden_size; required by module's `linear`)
HIDDEN    = 32            # conf.hidden_size
BATCH     = 4
SEQ       = 8

_VMEM = pl.BlockSpec(memory_space=pltpu.MemorySpace.VMEM)


# --------------------------- fused forward kernel ---------------------------
def _mrg_fused_kernel(uid_ref, iid_ref, lbl_ref, ri_ref, ro_ref,
                      uemb_ref, vemb_ref, wemb_ref,
                      w1i_ref, b1i_ref, w2_ref, b2_ref, wp_ref, bp_ref,
                      wihr_ref, wihz_ref, wihn_ref,
                      bgr_ref, bgz_ref, bgn_ref, bhn_ref,
                      whhr_ref, whhz_ref, whhn_ref,
                      wl_ref, bl_ref,
                      pred_ref, losses_ref):
    f32 = jnp.float32

    # ---- embedding gathers as one-hot matmuls (exact in f32, single MXU push each)
    def gather(idx_col_ref, table_ref, depth):
        idx = idx_col_ref[...]                                     # [N, 1] int32
        ids = jax.lax.broadcasted_iota(jnp.int32, (idx.shape[0], depth), 1)
        return jnp.dot((ids == idx).astype(f32), table_ref[...],
                       preferred_element_type=f32)

    u = gather(uid_ref, uemb_ref, NUM_USERS)                       # [B, E]
    v = gather(iid_ref, vemb_ref, NUM_ITEMS)                       # [B, E]
    x_flat = gather(ri_ref, wemb_ref, VOCAB)                       # [T*B, W]

    # ---- rating MLP + initial hidden (mlp_1 and initial_layer merged: shared LHS)
    z1 = jnp.concatenate([u, v], axis=1)                           # [B, 2E]
    z1p = jnp.dot(z1, w1i_ref[...], preferred_element_type=f32) + b1i_ref[...]
    z2 = jnp.tanh(z1p[:, :EMB])                                    # mlp_1 + tanh
    h = z1p[:, EMB:]                                               # initial_layer -> h_0
    z3 = jnp.tanh(jnp.dot(z2, w2_ref[...], preferred_element_type=f32) + b2_ref[...])
    pred = jnp.dot(z3, wp_ref[...], preferred_element_type=f32) + bp_ref[...]
    pred_ref[...] = pred
    diff = pred - lbl_ref[...]
    rating_loss = jnp.mean(diff * diff)

    # ---- GRU: hoist input-to-hidden GEMMs over all timesteps (M = T*B)
    # r/z biases pre-summed (b_ih + b_hh); n keeps b_ih_n here, b_hh_n in-loop.
    gi_r = jnp.dot(x_flat, wihr_ref[...], preferred_element_type=f32) + bgr_ref[...]
    gi_z = jnp.dot(x_flat, wihz_ref[...], preferred_element_type=f32) + bgz_ref[...]
    gi_n = jnp.dot(x_flat, wihn_ref[...], preferred_element_type=f32) + bgn_ref[...]

    whh_r = whhr_ref[...]
    whh_z = whhz_ref[...]
    whh_n = whhn_ref[...]
    b_hn = bhn_ref[...]

    hs = []
    for t in range(SEQ):   # fully unrolled: SEQ is static -> static row slices
        s = t * BATCH
        gh_r = jnp.dot(h, whh_r, preferred_element_type=f32)
        gh_z = jnp.dot(h, whh_z, preferred_element_type=f32)
        gh_n = jnp.dot(h, whh_n, preferred_element_type=f32) + b_hn
        r = jax.nn.sigmoid(gi_r[s:s + BATCH] + gh_r)
        z = jax.nn.sigmoid(gi_z[s:s + BATCH] + gh_z)
        n = jnp.tanh(gi_n[s:s + BATCH] + r * gh_n)
        h = (1.0 - z) * n + z * h
        hs.append(h)
    hs_flat = jnp.concatenate(hs, axis=0)                          # [T*B, H]

    # ---- vocab projection + NLL (single M = T*B GEMM)
    logits = jnp.tanh(jnp.dot(hs_flat, wl_ref[...], preferred_element_type=f32)
                      + bl_ref[...])                               # Pwt
    m = jnp.max(logits, axis=-1, keepdims=True)
    shifted = logits - m
    lse = jnp.log(jnp.sum(jnp.exp(shifted), axis=-1, keepdims=True))
    logp = shifted - lse                                           # log_softmax
    tgt_mask = jax.lax.broadcasted_iota(jnp.int32, logits.shape, 1) == ro_ref[...]
    picked = jnp.sum(jnp.where(tgt_mask, logp, 0.0), axis=-1, keepdims=True)
    gen_loss = -jnp.mean(picked)

    losses_ref[...] = jnp.concatenate([rating_loss.reshape(1, 1),
                                       gen_loss.reshape(1, 1)], axis=1)


# ------------------------------- full forward -------------------------------
def mrg_forward(params, user, item, label, review_input, review_output):
    H = HIDDEN
    w_ih_t, w_hh_t = params["w_ih_t"], params["w_hh_t"]
    b_ih, b_hh = params["b_ih"], params["b_hh"]

    # per-gate GRU weights (PyTorch gate order r, z, n), r/z biases pre-summed
    wih_r, wih_z, wih_n = w_ih_t[:, :H], w_ih_t[:, H:2 * H], w_ih_t[:, 2 * H:]
    whh_r, whh_z, whh_n = w_hh_t[:, :H], w_hh_t[:, H:2 * H], w_hh_t[:, 2 * H:]
    b_gr = (b_ih[:H] + b_hh[:H]).reshape(1, H)
    b_gz = (b_ih[H:2 * H] + b_hh[H:2 * H]).reshape(1, H)
    b_gn = b_ih[2 * H:].reshape(1, H)
    b_hn = b_hh[2 * H:].reshape(1, H)

    # mlp_1 and initial_layer merged along the output axis (shared LHS [u, v])
    w1i = jnp.concatenate([params["w1_t"], params["wi_t"]], axis=1)    # [2E, E+H]
    b1i = jnp.concatenate([params["b1"], params["bi"]]).reshape(1, EMB + H)

    pred, losses = pl.pallas_call(
        _mrg_fused_kernel,
        out_shape=(jax.ShapeDtypeStruct((BATCH, 1), jnp.float32),
                   jax.ShapeDtypeStruct((1, 2), jnp.float32)),
        in_specs=[_VMEM] * 26,
        out_specs=(_VMEM, _VMEM),
    )(user.reshape(BATCH, 1).astype(jnp.int32),
      item.reshape(BATCH, 1).astype(jnp.int32),
      label.reshape(BATCH, 1).astype(jnp.float32),
      review_input.reshape(SEQ * BATCH, 1).astype(jnp.int32),
      review_output.reshape(SEQ * BATCH, 1).astype(jnp.int32),
      params["user_emb"], params["item_emb"], params["word_emb"],
      w1i, b1i,
      params["w2_t"], params["b2"].reshape(1, -1),
      params["wp_t"], params["bp"].reshape(1, -1),
      wih_r, wih_z, wih_n,
      b_gr, b_gz, b_gn, b_hn,
      whh_r, whh_z, whh_n,
      params["wl_t"], params["bl"].reshape(1, -1))

    rating_loss = losses[0, 0]
    gen_loss = losses[0, 1]
    obj_loss = rating_loss + gen_loss
    return pred, rating_loss, gen_loss, obj_loss


def init_params(key):
    ks = jax.random.split(key, 12)
    s = 0.1
    return {
        "user_emb": jax.random.normal(ks[0], (NUM_USERS, EMB), jnp.float32) * s,
        "item_emb": jax.random.normal(ks[1], (NUM_ITEMS, EMB), jnp.float32) * s,
        "word_emb": jax.random.normal(ks[2], (VOCAB, WORD_DIM), jnp.float32) * s,
        # mlp_1: Linear(2E -> E), stored transposed [2E, E]
        "w1_t": jax.random.normal(ks[3], (2 * EMB, EMB), jnp.float32) * s,
        "b1": jnp.zeros((EMB,), jnp.float32),
        # mlp_2: Linear(E -> E/2)
        "w2_t": jax.random.normal(ks[4], (EMB, EMB_HALF), jnp.float32) * s,
        "b2": jnp.zeros((EMB_HALF,), jnp.float32),
        # prediction_layer: Linear(E/2 -> 1)
        "wp_t": jax.random.normal(ks[5], (EMB_HALF, 1), jnp.float32) * s,
        "bp": jnp.zeros((1,), jnp.float32),
        # initial_layer: Linear(2E -> H)
        "wi_t": jax.random.normal(ks[6], (2 * EMB, HIDDEN), jnp.float32) * s,
        "bi": jnp.zeros((HIDDEN,), jnp.float32),
        # GRU(W -> H), gates in (r, z, n) order, stored transposed [in, 3H]
        "w_ih_t": jax.random.normal(ks[7], (WORD_DIM, 3 * HIDDEN), jnp.float32) * s,
        "w_hh_t": jax.random.normal(ks[8], (HIDDEN, 3 * HIDDEN), jnp.float32) * s,
        "b_ih": jnp.zeros((3 * HIDDEN,), jnp.float32),
        "b_hh": jnp.zeros((3 * HIDDEN,), jnp.float32),
        # linear: Linear(W -> V) (word_dim == hidden_size, as the module requires)
        "wl_t": jax.random.normal(ks[9], (WORD_DIM, VOCAB), jnp.float32) * s,
        "bl": jnp.zeros((VOCAB,), jnp.float32),
    }
    # TODO(synk): nn.GRU's dropout=0.4 is a no-op with num_layers=1, so it is not modeled.


if __name__ == "__main__":
    key = jax.random.PRNGKey(0)
    pkey, k_u, k_i, k_l, k_ri, k_ro = jax.random.split(key, 6)
    params = init_params(pkey)

    user = jax.random.randint(k_u, (BATCH,), 0, NUM_USERS, dtype=jnp.int32)
    item = jax.random.randint(k_i, (BATCH,), 0, NUM_ITEMS, dtype=jnp.int32)
    label = jax.random.uniform(k_l, (BATCH,), jnp.float32, 1.0, 5.0)
    review_input = jax.random.randint(k_ri, (SEQ, BATCH), 0, VOCAB, dtype=jnp.int32)
    review_output = jax.random.randint(k_ro, (SEQ, BATCH), 0, VOCAB, dtype=jnp.int32)

    pred, rating_loss, gen_loss, obj_loss = jax.jit(mrg_forward)(
        params, user, item, label, review_input, review_output)
    jax.block_until_ready((pred, rating_loss, gen_loss, obj_loss))
    print("KERNEL_OK")
</pallas_src>

<mosaic_0001>
module attributes {stable_mosaic.version = 11 : i64} {
  func.func @_mrg_fused_kernel(%arg0: memref<4x1xi32, #tpu.memory_space<vmem>>, %arg1: memref<4x1xi32, #tpu.memory_space<vmem>>, %arg2: memref<4x1xf32, #tpu.memory_space<vmem>>, %arg3: memref<32x1xi32, #tpu.memory_space<vmem>>, %arg4: memref<32x1xi32, #tpu.memory_space<vmem>>, %arg5: memref<10x32xf32, #tpu.memory_space<vmem>>, %arg6: memref<12x32xf32, #tpu.memory_space<vmem>>, %arg7: memref<64x32xf32, #tpu.memory_space<vmem>>, %arg8: memref<64x64xf32, #tpu.memory_space<vmem>>, %arg9: memref<1x64xf32, #tpu.memory_space<vmem>>, %arg10: memref<32x16xf32, #tpu.memory_space<vmem>>, %arg11: memref<1x16xf32, #tpu.memory_space<vmem>>, %arg12: memref<16x1xf32, #tpu.memory_space<vmem>>, %arg13: memref<1x1xf32, #tpu.memory_space<vmem>>, %arg14: memref<32x32xf32, #tpu.memory_space<vmem>>, %arg15: memref<32x32xf32, #tpu.memory_space<vmem>>, %arg16: memref<32x32xf32, #tpu.memory_space<vmem>>, %arg17: memref<1x32xf32, #tpu.memory_space<vmem>>, %arg18: memref<1x32xf32, #tpu.memory_space<vmem>>, %arg19: memref<1x32xf32, #tpu.memory_space<vmem>>, %arg20: memref<1x32xf32, #tpu.memory_space<vmem>>, %arg21: memref<32x32xf32, #tpu.memory_space<vmem>>, %arg22: memref<32x32xf32, #tpu.memory_space<vmem>>, %arg23: memref<32x32xf32, #tpu.memory_space<vmem>>, %arg24: memref<32x64xf32, #tpu.memory_space<vmem>>, %arg25: memref<1x64xf32, #tpu.memory_space<vmem>>, %arg26: memref<4x1xf32, #tpu.memory_space<vmem>>, %arg27: memref<1x2xf32, #tpu.memory_space<vmem>>) attributes {dimension_semantics = [], scalar_prefetch = 0 : i64, scratch_operands = 0 : i64, tpu.core_type = #tpu.core_type<tc>} {
    %c0 = arith.constant 0 : index
    %c0_0 = arith.constant 0 : index
    %0 = vector.load %arg0[%c0, %c0_0] : memref<4x1xi32, #tpu.memory_space<vmem>>, vector<4x1xi32>
    %1 = tpu.iota {dimensions = array<i32: 1>} : vector<4x10xi32>
    %2 = vector.broadcast %0 : vector<4x1xi32> to vector<4x10xi32>
    %3 = arith.cmpi eq, %1, %2 : vector<4x10xi32>
    %4 = arith.extui %3 : vector<4x10xi1> to vector<4x10xi32>
    %5 = arith.sitofp %4 : vector<4x10xi32> to vector<4x10xf32>
    %c0_1 = arith.constant 0 : index
    %c0_2 = arith.constant 0 : index
    %6 = vector.load %arg5[%c0_1, %c0_2] : memref<10x32xf32, #tpu.memory_space<vmem>>, vector<10x32xf32>
    %cst = arith.constant dense<0.000000e+00> : vector<4x32xf32>
    %7 = tpu.matmul %5, %6, %cst {dimension_numbers = #tpu.dot_dimension_numbers<[1], [0], [0], [1], [0, 0, 1, 1], [], []>} : vector<4x10xf32>, vector<10x32xf32>, vector<4x32xf32> -> vector<4x32xf32>
    %c0_3 = arith.constant 0 : index
    %c0_4 = arith.constant 0 : index
    %8 = vector.load %arg1[%c0_3, %c0_4] : memref<4x1xi32, #tpu.memory_space<vmem>>, vector<4x1xi32>
    %9 = tpu.iota {dimensions = array<i32: 1>} : vector<4x12xi32>
    %10 = vector.broadcast %8 : vector<4x1xi32> to vector<4x12xi32>
    %11 = arith.cmpi eq, %9, %10 : vector<4x12xi32>
    %12 = arith.extui %11 : vector<4x12xi1> to vector<4x12xi32>
    %13 = arith.sitofp %12 : vector<4x12xi32> to vector<4x12xf32>
    %c0_5 = arith.constant 0 : index
    %c0_6 = arith.constant 0 : index
    %14 = vector.load %arg6[%c0_5, %c0_6] : memref<12x32xf32, #tpu.memory_space<vmem>>, vector<12x32xf32>
    %cst_7 = arith.constant dense<0.000000e+00> : vector<4x32xf32>
    %15 = tpu.matmul %13, %14, %cst_7 {dimension_numbers = #tpu.dot_dimension_numbers<[1], [0], [0], [1], [0, 0, 1, 1], [], []>} : vector<4x12xf32>, vector<12x32xf32>, vector<4x32xf32> -> vector<4x32xf32>
    %c0_8 = arith.constant 0 : index
    %c0_9 = arith.constant 0 : index
    %16 = vector.load %arg3[%c0_8, %c0_9] : memref<32x1xi32, #tpu.memory_space<vmem>>, vector<32x1xi32>
    %17 = tpu.iota {dimensions = array<i32: 1>} : vector<32x64xi32>
    %18 = vector.broadcast %16 : vector<32x1xi32> to vector<32x64xi32>
    %19 = arith.cmpi eq, %17, %18 : vector<32x64xi32>
    %20 = arith.extui %19 : vector<32x64xi1> to vector<32x64xi32>
    %21 = arith.sitofp %20 : vector<32x64xi32> to vector<32x64xf32>
    %c0_10 = arith.constant 0 : index
    %c0_11 = arith.constant 0 : index
    %22 = vector.load %arg7[%c0_10, %c0_11] : memref<64x32xf32, #tpu.memory_space<vmem>>, vector<64x32xf32>
    %cst_12 = arith.constant dense<0.000000e+00> : vector<32x32xf32>
    %23 = tpu.matmul %21, %22, %cst_12 {dimension_numbers = #tpu.dot_dimension_numbers<[1], [0], [0], [1], [0, 0, 1, 1], [], []>} : vector<32x64xf32>, vector<64x32xf32>, vector<32x32xf32> -> vector<32x32xf32>
    %24 = tpu.concatenate %7, %15 in 1 : vector<4x32xf32>, vector<4x32xf32> -> vector<4x64xf32>
    %c0_13 = arith.constant 0 : index
    %c0_14 = arith.constant 0 : index
    %25 = vector.load %arg8[%c0_13, %c0_14] : memref<64x64xf32, #tpu.memory_space<vmem>>, vector<64x64xf32>
    %cst_15 = arith.constant dense<0.000000e+00> : vector<4x64xf32>
    %26 = tpu.matmul %24, %25, %cst_15 {dimension_numbers = #tpu.dot_dimension_numbers<[1], [0], [0], [1], [0, 0, 1, 1], [], []>} : vector<4x64xf32>, vector<64x64xf32>, vector<4x64xf32> -> vector<4x64xf32>
    %c0_16 = arith.constant 0 : index
    %c0_17 = arith.constant 0 : index
    %27 = vector.load %arg9[%c0_16, %c0_17] : memref<1x64xf32, #tpu.memory_space<vmem>>, vector<1x64xf32>
    %28 = vector.broadcast %27 : vector<1x64xf32> to vector<4x64xf32>
    %29 = arith.addf %26, %28 : vector<4x64xf32>
    %30 = vector.extract_strided_slice %29 {offsets = [0, 0], sizes = [4, 32], strides = [1, 1]} : vector<4x64xf32> to vector<4x32xf32>
    %31 = math.tanh %30 : vector<4x32xf32>
    %32 = vector.extract_strided_slice %29 {offsets = [0, 32], sizes = [4, 32], strides = [1, 1]} : vector<4x64xf32> to vector<4x32xf32>
    %c0_18 = arith.constant 0 : index
    %c0_19 = arith.constant 0 : index
    %33 = vector.load %arg10[%c0_18, %c0_19] : memref<32x16xf32, #tpu.memory_space<vmem>>, vector<32x16xf32>
    %cst_20 = arith.constant dense<0.000000e+00> : vector<4x16xf32>
    %34 = tpu.matmul %31, %33, %cst_20 {dimension_numbers = #tpu.dot_dimension_numbers<[1], [0], [0], [1], [0, 0, 1, 1], [], []>} : vector<4x32xf32>, vector<32x16xf32>, vector<4x16xf32> -> vector<4x16xf32>
    %c0_21 = arith.constant 0 : index
    %c0_22 = arith.constant 0 : index
    %35 = vector.load %arg11[%c0_21, %c0_22] : memref<1x16xf32, #tpu.memory_space<vmem>>, vector<1x16xf32>
    %36 = vector.broadcast %35 : vector<1x16xf32> to vector<4x16xf32>
    %37 = arith.addf %34, %36 : vector<4x16xf32>
    %38 = math.tanh %37 : vector<4x16xf32>
    %c0_23 = arith.constant 0 : index
    %c0_24 = arith.constant 0 : index
    %39 = vector.load %arg12[%c0_23, %c0_24] : memref<16x1xf32, #tpu.memory_space<vmem>>, vector<16x1xf32>
    %cst_25 = arith.constant dense<0.000000e+00> : vector<4x1xf32>
    %40 = tpu.matmul %38, %39, %cst_25 {dimension_numbers = #tpu.dot_dimension_numbers<[1], [0], [0], [1], [0, 0, 1, 1], [], []>} : vector<4x16xf32>, vector<16x1xf32>, vector<4x1xf32> -> vector<4x1xf32>
    %c0_26 = arith.constant 0 : index
    %c0_27 = arith.constant 0 : index
    %41 = vector.load %arg13[%c0_26, %c0_27] : memref<1x1xf32, #tpu.memory_space<vmem>>, vector<1x1xf32>
    %42 = vector.broadcast %41 : vector<1x1xf32> to vector<4x1xf32>
    %43 = arith.addf %40, %42 : vector<4x1xf32>
    %c0_28 = arith.constant 0 : index
    %c0_29 = arith.constant 0 : index
    %44 = vector.load %arg26[%c0_28, %c0_29] : memref<4x1xf32, #tpu.memory_space<vmem>>, vector<4x1xf32>
    tpu.vector_store %arg26[%c0_28, %c0_29], %43 {strides = array<i32>} : memref<4x1xf32, #tpu.memory_space<vmem>>, vector<4x1xf32>,
    %c0_30 = arith.constant 0 : index
    %c0_31 = arith.constant 0 : index
    %45 = vector.load %arg2[%c0_30, %c0_31] : memref<4x1xf32, #tpu.memory_space<vmem>>, vector<4x1xf32>
    %46 = arith.subf %43, %45 : vector<4x1xf32>
    %47 = arith.mulf %46, %46 : vector<4x1xf32>
    %48 = vector.shape_cast %47 : vector<4x1xf32> to vector<1x4x1xf32>
    %cst_32 = arith.constant dense<0.000000e+00> : vector<1xf32>
    %49 = vector.multi_reduction <add>, %48, %cst_32 [1, 2] : vector<1x4x1xf32> to vector<1xf32>
    %50 = vector.shape_cast %49 : vector<1xf32> to vector<1x1x1xf32>
    %51 = vector.extract %50[0, 0, 0] : f32 from vector<1x1x1xf32>
    %cst_33 = arith.constant 4.000000e+00 : f32
    %52 = arith.divf %51, %cst_33 : f32
    %c0_34 = arith.constant 0 : index
    %c0_35 = arith.constant 0 : index
    %53 = vector.load %arg14[%c0_34, %c0_35] : memref<32x32xf32, #tpu.memory_space<vmem>>, vector<32x32xf32>
    %cst_36 = arith.constant dense<0.000000e+00> : vector<32x32xf32>
    %54 = tpu.matmul %23, %53, %cst_36 {dimension_numbers = #tpu.dot_dimension_numbers<[1], [0], [0], [1], [0, 0, 1, 1], [], []>} : vector<32x32xf32>, vector<32x32xf32>, vector<32x32xf32> -> vector<32x32xf32>
    %c0_37 = arith.constant 0 : index
    %c0_38 = arith.constant 0 : index
    %55 = vector.load %arg17[%c0_37, %c0_38] : memref<1x32xf32, #tpu.memory_space<vmem>>, vector<1x32xf32>
    %56 = vector.broadcast %55 : vector<1x32xf32> to vector<32x32xf32>
    %57 = arith.addf %54, %56 : vector<32x32xf32>
    %c0_39 = arith.constant 0 : index
    %c0_40 = arith.constant 0 : index
    %58 = vector.load %arg15[%c0_39, %c0_40] : memref<32x32xf32, #tpu.memory_space<vmem>>, vector<32x32xf32>
    %cst_41 = arith.constant dense<0.000000e+00> : vector<32x32xf32>
    %59 = tpu.matmul %23, %58, %cst_41 {dimension_numbers = #tpu.dot_dimension_numbers<[1], [0], [0], [1], [0, 0, 1, 1], [], []>} : vector<32x32xf32>, vector<32x32xf32>, vector<32x32xf32> -> vector<32x32xf32>
    %c0_42 = arith.constant 0 : index
    %c0_43 = arith.constant 0 : index
    %60 = vector.load %arg18[%c0_42, %c0_43] : memref<1x32xf32, #tpu.memory_space<vmem>>, vector<1x32xf32>
    %61 = vector.broadcast %60 : vector<1x32xf32> to vector<32x32xf32>
    %62 = arith.addf %59, %61 : vector<32x32xf32>
    %c0_44 = arith.constant 0 : index
    %c0_45 = arith.constant 0 : index
    %63 = vector.load %arg16[%c0_44, %c0_45] : memref<32x32xf32, #tpu.memory_space<vmem>>, vector<32x32xf32>
    %cst_46 = arith.constant dense<0.000000e+00> : vector<32x32xf32>
    %64 = tpu.matmul %23, %63, %cst_46 {dimension_numbers = #tpu.dot_dimension_numbers<[1], [0], [0], [1], [0, 0, 1, 1], [], []>} : vector<32x32xf32>, vector<32x32xf32>, vector<32x32xf32> -> vector<32x32xf32>
    %c0_47 = arith.constant 0 : index
    %c0_48 = arith.constant 0 : index
    %65 = vector.load %arg19[%c0_47, %c0_48] : memref<1x32xf32, #tpu.memory_space<vmem>>, vector<1x32xf32>
    %66 = vector.broadcast %65 : vector<1x32xf32> to vector<32x32xf32>
    %67 = arith.addf %64, %66 : vector<32x32xf32>
    %c0_49 = arith.constant 0 : index
    %c0_50 = arith.constant 0 : index
    %68 = vector.load %arg21[%c0_49, %c0_50] : memref<32x32xf32, #tpu.memory_space<vmem>>, vector<32x32xf32>
    %c0_51 = arith.constant 0 : index
    %c0_52 = arith.constant 0 : index
    %69 = vector.load %arg22[%c0_51, %c0_52] : memref<32x32xf32, #tpu.memory_space<vmem>>, vector<32x32xf32>
    %c0_53 = arith.constant 0 : index
    %c0_54 = arith.constant 0 : index
    %70 = vector.load %arg23[%c0_53, %c0_54] : memref<32x32xf32, #tpu.memory_space<vmem>>, vector<32x32xf32>
    %c0_55 = arith.constant 0 : index
    %c0_56 = arith.constant 0 : index
    %71 = vector.load %arg20[%c0_55, %c0_56] : memref<1x32xf32, #tpu.memory_space<vmem>>, vector<1x32xf32>
    %cst_57 = arith.constant dense<0.000000e+00> : vector<4x32xf32>
    %72 = tpu.matmul %32, %68, %cst_57 {dimension_numbers = #tpu.dot_dimension_numbers<[1], [0], [0], [1], [0, 0, 1, 1], [], []>} : vector<4x32xf32>, vector<32x32xf32>, vector<4x32xf32> -> vector<4x32xf32>
    %cst_58 = arith.constant dense<0.000000e+00> : vector<4x32xf32>
    %73 = tpu.matmul %32, %69, %cst_58 {dimension_numbers = #tpu.dot_dimension_numbers<[1], [0], [0], [1], [0, 0, 1, 1], [], []>} : vector<4x32xf32>, vector<32x32xf32>, vector<4x32xf32> -> vector<4x32xf32>
    %cst_59 = arith.constant dense<0.000000e+00> : vector<4x32xf32>
    %74 = tpu.matmul %32, %70, %cst_59 {dimension_numbers = #tpu.dot_dimension_numbers<[1], [0], [0], [1], [0, 0, 1, 1], [], []>} : vector<4x32xf32>, vector<32x32xf32>, vector<4x32xf32> -> vector<4x32xf32>
    %75 = vector.broadcast %71 : vector<1x32xf32> to vector<4x32xf32>
    %76 = arith.addf %74, %75 : vector<4x32xf32>
    %77 = vector.extract_strided_slice %57 {offsets = [0, 0], sizes = [4, 32], strides = [1, 1]} : vector<32x32xf32> to vector<4x32xf32>
    %78 = arith.addf %77, %72 : vector<4x32xf32>
    %79 = arith.negf %78 : vector<4x32xf32>
    %80 = math.exp %79 : vector<4x32xf32>
    %cst_60 = arith.constant 1.000000e+00 : f32
    %81 = vector.broadcast %cst_60 : f32 to vector<4x32xf32>
    %82 = arith.addf %81, %80 : vector<4x32xf32>
    %83 = arith.divf %81, %82 : vector<4x32xf32>
    %84 = vector.extract_strided_slice %62 {offsets = [0, 0], sizes = [4, 32], strides = [1, 1]} : vector<32x32xf32> to vector<4x32xf32>
    %85 = arith.addf %84, %73 : vector<4x32xf32>
    %86 = arith.negf %85 : vector<4x32xf32>
    %87 = math.exp %86 : vector<4x32xf32>
    %cst_61 = arith.constant 1.000000e+00 : f32
    %88 = vector.broadcast %cst_61 : f32 to vector<4x32xf32>
    %89 = arith.addf %88, %87 : vector<4x32xf32>
    %90 = arith.divf %88, %89 : vector<4x32xf32>
    %91 = vector.extract_strided_slice %67 {offsets = [0, 0], sizes = [4, 32], strides = [1, 1]} : vector<32x32xf32> to vector<4x32xf32>
    %92 = arith.mulf %83, %76 : vector<4x32xf32>
    %93 = arith.addf %91, %92 : vector<4x32xf32>
    %94 = math.tanh %93 : vector<4x32xf32>
    %cst_62 = arith.constant 1.000000e+00 : f32
    %95 = vector.broadcast %cst_62 : f32 to vector<4x32xf32>
    %96 = arith.subf %95, %90 : vector<4x32xf32>
    %97 = arith.mulf %96, %94 : vector<4x32xf32>
    %98 = arith.mulf %90, %32 : vector<4x32xf32>
    %99 = arith.addf %97, %98 : vector<4x32xf32>
    %cst_63 = arith.constant dense<0.000000e+00> : vector<4x32xf32>
    %100 = tpu.matmul %99, %68, %cst_63 {dimension_numbers = #tpu.dot_dimension_numbers<[1], [0], [0], [1], [0, 0, 1, 1], [], []>} : vector<4x32xf32>, vector<32x32xf32>, vector<4x32xf32> -> vector<4x32xf32>
    %cst_64 = arith.constant dense<0.000000e+00> : vector<4x32xf32>
    %101 = tpu.matmul %99, %69, %cst_64 {dimension_numbers = #tpu.dot_dimension_numbers<[1], [0], [0], [1], [0, 0, 1, 1], [], []>} : vector<4x32xf32>, vector<32x32xf32>, vector<4x32xf32> -> vector<4x32xf32>
    %cst_65 = arith.constant dense<0.000000e+00> : vector<4x32xf32>
    %102 = tpu.matmul %99, %70, %cst_65 {dimension_numbers = #tpu.dot_dimension_numbers<[1], [0], [0], [1], [0, 0, 1, 1], [], []>} : vector<4x32xf32>, vector<32x32xf32>, vector<4x32xf32> -> vector<4x32xf32>
    %103 = vector.broadcast %71 : vector<1x32xf32> to vector<4x32xf32>
    %104 = arith.addf %102, %103 : vector<4x32xf32>
    %105 = vector.extract_strided_slice %57 {offsets = [4, 0], sizes = [4, 32], strides = [1, 1]} : vector<32x32xf32> to vector<4x32xf32>
    %106 = arith.addf %105, %100 : vector<4x32xf32>
    %107 = arith.negf %106 : vector<4x32xf32>
    %108 = math.exp %107 : vector<4x32xf32>
    %cst_66 = arith.constant 1.000000e+00 : f32
    %109 = vector.broadcast %cst_66 : f32 to vector<4x32xf32>
    %110 = arith.addf %109, %108 : vector<4x32xf32>
    %111 = arith.divf %109, %110 : vector<4x32xf32>
    %112 = vector.extract_strided_slice %62 {offsets = [4, 0], sizes = [4, 32], strides = [1, 1]} : vector<32x32xf32> to vector<4x32xf32>
    %113 = arith.addf %112, %101 : vector<4x32xf32>
    %114 = arith.negf %113 : vector<4x32xf32>
    %115 = math.exp %114 : vector<4x32xf32>
    %cst_67 = arith.constant 1.000000e+00 : f32
    %116 = vector.broadcast %cst_67 : f32 to vector<4x32xf32>
    %117 = arith.addf %116, %115 : vector<4x32xf32>
    %118 = arith.divf %116, %117 : vector<4x32xf32>
    %119 = vector.extract_strided_slice %67 {offsets = [4, 0], sizes = [4, 32], strides = [1, 1]} : vector<32x32xf32> to vector<4x32xf32>
    %120 = arith.mulf %111, %104 : vector<4x32xf32>
    %121 = arith.addf %119, %120 : vector<4x32xf32>
    %122 = math.tanh %121 : vector<4x32xf32>
    %cst_68 = arith.constant 1.000000e+00 : f32
    %123 = vector.broadcast %cst_68 : f32 to vector<4x32xf32>
    %124 = arith.subf %123, %118 : vector<4x32xf32>
    %125 = arith.mulf %124, %122 : vector<4x32xf32>
    %126 = arith.mulf %118, %99 : vector<4x32xf32>
    %127 = arith.addf %125, %126 : vector<4x32xf32>
    %cst_69 = arith.constant dense<0.000000e+00> : vector<4x32xf32>
    %128 = tpu.matmul %127, %68, %cst_69 {dimension_numbers = #tpu.dot_dimension_numbers<[1], [0], [0], [1], [0, 0, 1, 1], [], []>} : vector<4x32xf32>, vector<32x32xf32>, vector<4x32xf32> -> vector<4x32xf32>
    %cst_70 = arith.constant dense<0.000000e+00> : vector<4x32xf32>
    %129 = tpu.matmul %127, %69, %cst_70 {dimension_numbers = #tpu.dot_dimension_numbers<[1], [0], [0], [1], [0, 0, 1, 1], [], []>} : vector<4x32xf32>, vector<32x32xf32>, vector<4x32xf32> -> vector<4x32xf32>
    %cst_71 = arith.constant dense<0.000000e+00> : vector<4x32xf32>
    %130 = tpu.matmul %127, %70, %cst_71 {dimension_numbers = #tpu.dot_dimension_numbers<[1], [0], [0], [1], [0, 0, 1, 1], [], []>} : vector<4x32xf32>, vector<32x32xf32>, vector<4x32xf32> -> vector<4x32xf32>
    %131 = vector.broadcast %71 : vector<1x32xf32> to vector<4x32xf32>
    %132 = arith.addf %130, %131 : vector<4x32xf32>
    %133 = vector.extract_strided_slice %57 {offsets = [8, 0], sizes = [4, 32], strides = [1, 1]} : vector<32x32xf32> to vector<4x32xf32>
    %134 = arith.addf %133, %128 : vector<4x32xf32>
    %135 = arith.negf %134 : vector<4x32xf32>
    %136 = math.exp %135 : vector<4x32xf32>
    %cst_72 = arith.constant 1.000000e+00 : f32
    %137 = vector.broadcast %cst_72 : f32 to vector<4x32xf32>
    %138 = arith.addf %137, %136 : vector<4x32xf32>
    %139 = arith.divf %137, %138 : vector<4x32xf32>
    %140 = vector.extract_strided_slice %62 {offsets = [8, 0], sizes = [4, 32], strides = [1, 1]} : vector<32x32xf32> to vector<4x32xf32>
    %141 = arith.addf %140, %129 : vector<4x32xf32>
    %142 = arith.negf %141 : vector<4x32xf32>
    %143 = math.exp %142 : vector<4x32xf32>
    %cst_73 = arith.constant 1.000000e+00 : f32
    %144 = vector.broadcast %cst_73 : f32 to vector<4x32xf32>
    %145 = arith.addf %144, %143 : vector<4x32xf32>
    %146 = arith.divf %144, %145 : vector<4x32xf32>
    %147 = vector.extract_strided_slice %67 {offsets = [8, 0], sizes = [4, 32], strides = [1, 1]} : vector<32x32xf32> to vector<4x32xf32>
    %148 = arith.mulf %139, %132 : vector<4x32xf32>
    %149 = arith.addf %147, %148 : vector<4x32xf32>
    %150 = math.tanh %149 : vector<4x32xf32>
    %cst_74 = arith.constant 1.000000e+00 : f32
    %151 = vector.broadcast %cst_74 : f32 to vector<4x32xf32>
    %152 = arith.subf %151, %146 : vector<4x32xf32>
    %153 = arith.mulf %152, %150 : vector<4x32xf32>
    %154 = arith.mulf %146, %127 : vector<4x32xf32>
    %155 = arith.addf %153, %154 : vector<4x32xf32>
    %cst_75 = arith.constant dense<0.000000e+00> : vector<4x32xf32>
    %156 = tpu.matmul %155, %68, %cst_75 {dimension_numbers = #tpu.dot_dimension_numbers<[1], [0], [0], [1], [0, 0, 1, 1], [], []>} : vector<4x32xf32>, vector<32x32xf32>, vector<4x32xf32> -> vector<4x32xf32>
    %cst_76 = arith.constant dense<0.000000e+00> : vector<4x32xf32>
    %157 = tpu.matmul %155, %69, %cst_76 {dimension_numbers = #tpu.dot_dimension_numbers<[1], [0], [0], [1], [0, 0, 1, 1], [], []>} : vector<4x32xf32>, vector<32x32xf32>, vector<4x32xf32> -> vector<4x32xf32>
    %cst_77 = arith.constant dense<0.000000e+00> : vector<4x32xf32>
    %158 = tpu.matmul %155, %70, %cst_77 {dimension_numbers = #tpu.dot_dimension_numbers<[1], [0], [0], [1], [0, 0, 1, 1], [], []>} : vector<4x32xf32>, vector<32x32xf32>, vector<4x32xf32> -> vector<4x32xf32>
    %159 = vector.broadcast %71 : vector<1x32xf32> to vector<4x32xf32>
    %160 = arith.addf %158, %159 : vector<4x32xf32>
    %161 = vector.extract_strided_slice %57 {offsets = [12, 0], sizes = [4, 32], strides = [1, 1]} : vector<32x32xf32> to vector<4x32xf32>
    %162 = arith.addf %161, %156 : vector<4x32xf32>
    %163 = arith.negf %162 : vector<4x32xf32>
    %164 = math.exp %163 : vector<4x32xf32>
    %cst_78 = arith.constant 1.000000e+00 : f32
    %165 = vector.broadcast %cst_78 : f32 to vector<4x32xf32>
    %166 = arith.addf %165, %164 : vector<4x32xf32>
    %167 = arith.divf %165, %166 : vector<4x32xf32>
    %168 = vector.extract_strided_slice %62 {offsets = [12, 0], sizes = [4, 32], strides = [1, 1]} : vector<32x32xf32> to vector<4x32xf32>
    %169 = arith.addf %168, %157 : vector<4x32xf32>
    %170 = arith.negf %169 : vector<4x32xf32>
    %171 = math.exp %170 : vector<4x32xf32>
    %cst_79 = arith.constant 1.000000e+00 : f32
    %172 = vector.broadcast %cst_79 : f32 to vector<4x32xf32>
    %173 = arith.addf %172, %171 : vector<4x32xf32>
    %174 = arith.divf %172, %173 : vector<4x32xf32>
    %175 = vector.extract_strided_slice %67 {offsets = [12, 0], sizes = [4, 32], strides = [1, 1]} : vector<32x32xf32> to vector<4x32xf32>
    %176 = arith.mulf %167, %160 : vector<4x32xf32>
    %177 = arith.addf %175, %176 : vector<4x32xf32>
    %178 = math.tanh %177 : vector<4x32xf32>
    %cst_80 = arith.constant 1.000000e+00 : f32
    %179 = vector.broadcast %cst_80 : f32 to vector<4x32xf32>
    %180 = arith.subf %179, %174 : vector<4x32xf32>
    %181 = arith.mulf %180, %178 : vector<4x32xf32>
    %182 = arith.mulf %174, %155 : vector<4x32xf32>
    %183 = arith.addf %181, %182 : vector<4x32xf32>
    %cst_81 = arith.constant dense<0.000000e+00> : vector<4x32xf32>
    %184 = tpu.matmul %183, %68, %cst_81 {dimension_numbers = #tpu.dot_dimension_numbers<[1], [0], [0], [1], [0, 0, 1, 1], [], []>} : vector<4x32xf32>, vector<32x32xf32>, vector<4x32xf32> -> vector<4x32xf32>
    %cst_82 = arith.constant dense<0.000000e+00> : vector<4x32xf32>
    %185 = tpu.matmul %183, %69, %cst_82 {dimension_numbers = #tpu.dot_dimension_numbers<[1], [0], [0], [1], [0, 0, 1, 1], [], []>} : vector<4x32xf32>, vector<32x32xf32>, vector<4x32xf32> -> vector<4x32xf32>
    %cst_83 = arith.constant dense<0.000000e+00> : vector<4x32xf32>
    %186 = tpu.matmul %183, %70, %cst_83 {dimension_numbers = #tpu.dot_dimension_numbers<[1], [0], [0], [1], [0, 0, 1, 1], [], []>} : vector<4x32xf32>, vector<32x32xf32>, vector<4x32xf32> -> vector<4x32xf32>
    %187 = vector.broadcast %71 : vector<1x32xf32> to vector<4x32xf32>
    %188 = arith.addf %186, %187 : vector<4x32xf32>
    %189 = vector.extract_strided_slice %57 {offsets = [16, 0], sizes = [4, 32], strides = [1, 1]} : vector<32x32xf32> to vector<4x32xf32>
    %190 = arith.addf %189, %184 : vector<4x32xf32>
    %191 = arith.negf %190 : vector<4x32xf32>
    %192 = math.exp %191 : vector<4x32xf32>
    %cst_84 = arith.constant 1.000000e+00 : f32
    %193 = vector.broadcast %cst_84 : f32 to vector<4x32xf32>
    %194 = arith.addf %193, %192 : vector<4x32xf32>
    %195 = arith.divf %193, %194 : vector<4x32xf32>
    %196 = vector.extract_strided_slice %62 {offsets = [16, 0], sizes = [4, 32], strides = [1, 1]} : vector<32x32xf32> to vector<4x32xf32>
    %197 = arith.addf %196, %185 : vector<4x32xf32>
    %198 = arith.negf %197 : vector<4x32xf32>
    %199 = math.exp %198 : vector<4x32xf32>
    %cst_85 = arith.constant 1.000000e+00 : f32
    %200 = vector.broadcast %cst_85 : f32 to vector<4x32xf32>
    %201 = arith.addf %200, %199 : vector<4x32xf32>
    %202 = arith.divf %200, %201 : vector<4x32xf32>
    %203 = vector.extract_strided_slice %67 {offsets = [16, 0], sizes = [4, 32], strides = [1, 1]} : vector<32x32xf32> to vector<4x32xf32>
    %204 = arith.mulf %195, %188 : vector<4x32xf32>
    %205 = arith.addf %203, %204 : vector<4x32xf32>
    %206 = math.tanh %205 : vector<4x32xf32>
    %cst_86 = arith.constant 1.000000e+00 : f32
    %207 = vector.broadcast %cst_86 : f32 to vector<4x32xf32>
    %208 = arith.subf %207, %202 : vector<4x32xf32>
    %209 = arith.mulf %208, %206 : vector<4x32xf32>
    %210 = arith.mulf %202, %183 : vector<4x32xf32>
    %211 = arith.addf %209, %210 : vector<4x32xf32>
    %cst_87 = arith.constant dense<0.000000e+00> : vector<4x32xf32>
    %212 = tpu.matmul %211, %68, %cst_87 {dimension_numbers = #tpu.dot_dimension_numbers<[1], [0], [0], [1], [0, 0, 1, 1], [], []>} : vector<4x32xf32>, vector<32x32xf32>, vector<4x32xf32> -> vector<4x32xf32>
    %cst_88 = arith.constant dense<0.000000e+00> : vector<4x32xf32>
    %213 = tpu.matmul %211, %69, %cst_88 {dimension_numbers = #tpu.dot_dimension_numbers<[1], [0], [0], [1], [0, 0, 1, 1], [], []>} : vector<4x32xf32>, vector<32x32xf32>, vector<4x32xf32> -> vector<4x32xf32>
    %cst_89 = arith.constant dense<0.000000e+00> : vector<4x32xf32>
    %214 = tpu.matmul %211, %70, %cst_89 {dimension_numbers = #tpu.dot_dimension_numbers<[1], [0], [0], [1], [0, 0, 1, 1], [], []>} : vector<4x32xf32>, vector<32x32xf32>, vector<4x32xf32> -> vector<4x32xf32>
    %215 = vector.broadcast %71 : vector<1x32xf32> to vector<4x32xf32>
    %216 = arith.addf %214, %215 : vector<4x32xf32>
    %217 = vector.extract_strided_slice %57 {offsets = [20, 0], sizes = [4, 32], strides = [1, 1]} : vector<32x32xf32> to vector<4x32xf32>
    %218 = arith.addf %217, %212 : vector<4x32xf32>
    %219 = arith.negf %218 : vector<4x32xf32>
    %220 = math.exp %219 : vector<4x32xf32>
    %cst_90 = arith.constant 1.000000e+00 : f32
    %221 = vector.broadcast %cst_90 : f32 to vector<4x32xf32>
    %222 = arith.addf %221, %220 : vector<4x32xf32>
    %223 = arith.divf %221, %222 : vector<4x32xf32>
    %224 = vector.extract_strided_slice %62 {offsets = [20, 0], sizes = [4, 32], strides = [1, 1]} : vector<32x32xf32> to vector<4x32xf32>
    %225 = arith.addf %224, %213 : vector<4x32xf32>
    %226 = arith.negf %225 : vector<4x32xf32>
    %227 = math.exp %226 : vector<4x32xf32>
    %cst_91 = arith.constant 1.000000e+00 : f32
    %228 = vector.broadcast %cst_91 : f32 to vector<4x32xf32>
    %229 = arith.addf %228, %227 : vector<4x32xf32>
    %230 = arith.divf %228, %229 : vector<4x32xf32>
    %231 = vector.extract_strided_slice %67 {offsets = [20, 0], sizes = [4, 32], strides = [1, 1]} : vector<32x32xf32> to vector<4x32xf32>
    %232 = arith.mulf %223, %216 : vector<4x32xf32>
    %233 = arith.addf %231, %232 : vector<4x32xf32>
    %234 = math.tanh %233 : vector<4x32xf32>
    %cst_92 = arith.constant 1.000000e+00 : f32
    %235 = vector.broadcast %cst_92 : f32 to vector<4x32xf32>
    %236 = arith.subf %235, %230 : vector<4x32xf32>
    %237 = arith.mulf %236, %234 : vector<4x32xf32>
    %238 = arith.mulf %230, %211 : vector<4x32xf32>
    %239 = arith.addf %237, %238 : vector<4x32xf32>
    %cst_93 = arith.constant dense<0.000000e+00> : vector<4x32xf32>
    %240 = tpu.matmul %239, %68, %cst_93 {dimension_numbers = #tpu.dot_dimension_numbers<[1], [0], [0], [1], [0, 0, 1, 1], [], []>} : vector<4x32xf32>, vector<32x32xf32>, vector<4x32xf32> -> vector<4x32xf32>
    %cst_94 = arith.constant dense<0.000000e+00> : vector<4x32xf32>
    %241 = tpu.matmul %239, %69, %cst_94 {dimension_numbers = #tpu.dot_dimension_numbers<[1], [0], [0], [1], [0, 0, 1, 1], [], []>} : vector<4x32xf32>, vector<32x32xf32>, vector<4x32xf32> -> vector<4x32xf32>
    %cst_95 = arith.constant dense<0.000000e+00> : vector<4x32xf32>
    %242 = tpu.matmul %239, %70, %cst_95 {dimension_numbers = #tpu.dot_dimension_numbers<[1], [0], [0], [1], [0, 0, 1, 1], [], []>} : vector<4x32xf32>, vector<32x32xf32>, vector<4x32xf32> -> vector<4x32xf32>
    %243 = vector.broadcast %71 : vector<1x32xf32> to vector<4x32xf32>
    %244 = arith.addf %242, %243 : vector<4x32xf32>
    %245 = vector.extract_strided_slice %57 {offsets = [24, 0], sizes = [4, 32], strides = [1, 1]} : vector<32x32xf32> to vector<4x32xf32>
    %246 = arith.addf %245, %240 : vector<4x32xf32>
    %247 = arith.negf %246 : vector<4x32xf32>
    %248 = math.exp %247 : vector<4x32xf32>
    %cst_96 = arith.constant 1.000000e+00 : f32
    %249 = vector.broadcast %cst_96 : f32 to vector<4x32xf32>
    %250 = arith.addf %249, %248 : vector<4x32xf32>
    %251 = arith.divf %249, %250 : vector<4x32xf32>
    %252 = vector.extract_strided_slice %62 {offsets = [24, 0], sizes = [4, 32], strides = [1, 1]} : vector<32x32xf32> to vector<4x32xf32>
    %253 = arith.addf %252, %241 : vector<4x32xf32>
    %254 = arith.negf %253 : vector<4x32xf32>
    %255 = math.exp %254 : vector<4x32xf32>
    %cst_97 = arith.constant 1.000000e+00 : f32
    %256 = vector.broadcast %cst_97 : f32 to vector<4x32xf32>
    %257 = arith.addf %256, %255 : vector<4x32xf32>
    %258 = arith.divf %256, %257 : vector<4x32xf32>
    %259 = vector.extract_strided_slice %67 {offsets = [24, 0], sizes = [4, 32], strides = [1, 1]} : vector<32x32xf32> to vector<4x32xf32>
    %260 = arith.mulf %251, %244 : vector<4x32xf32>
    %261 = arith.addf %259, %260 : vector<4x32xf32>
    %262 = math.tanh %261 : vector<4x32xf32>
    %cst_98 = arith.constant 1.000000e+00 : f32
    %263 = vector.broadcast %cst_98 : f32 to vector<4x32xf32>
    %264 = arith.subf %263, %258 : vector<4x32xf32>
    %265 = arith.mulf %264, %262 : vector<4x32xf32>
    %266 = arith.mulf %258, %239 : vector<4x32xf32>
    %267 = arith.addf %265, %266 : vector<4x32xf32>
    %cst_99 = arith.constant dense<0.000000e+00> : vector<4x32xf32>
    %268 = tpu.matmul %267, %68, %cst_99 {dimension_numbers = #tpu.dot_dimension_numbers<[1], [0], [0], [1], [0, 0, 1, 1], [], []>} : vector<4x32xf32>, vector<32x32xf32>, vector<4x32xf32> -> vector<4x32xf32>
    %cst_100 = arith.constant dense<0.000000e+00> : vector<4x32xf32>
    %269 = tpu.matmul %267, %69, %cst_100 {dimension_numbers = #tpu.dot_dimension_numbers<[1], [0], [0], [1], [0, 0, 1, 1], [], []>} : vector<4x32xf32>, vector<32x32xf32>, vector<4x32xf32> -> vector<4x32xf32>
    %cst_101 = arith.constant dense<0.000000e+00> : vector<4x32xf32>
    %270 = tpu.matmul %267, %70, %cst_101 {dimension_numbers = #tpu.dot_dimension_numbers<[1], [0], [0], [1], [0, 0, 1, 1], [], []>} : vector<4x32xf32>, vector<32x32xf32>, vector<4x32xf32> -> vector<4x32xf32>
    %271 = vector.broadcast %71 : vector<1x32xf32> to vector<4x32xf32>
    %272 = arith.addf %270, %271 : vector<4x32xf32>
    %273 = vector.extract_strided_slice %57 {offsets = [28, 0], sizes = [4, 32], strides = [1, 1]} : vector<32x32xf32> to vector<4x32xf32>
    %274 = arith.addf %273, %268 : vector<4x32xf32>
    %275 = arith.negf %274 : vector<4x32xf32>
    %276 = math.exp %275 : vector<4x32xf32>
    %cst_102 = arith.constant 1.000000e+00 : f32
    %277 = vector.broadcast %cst_102 : f32 to vector<4x32xf32>
    %278 = arith.addf %277, %276 : vector<4x32xf32>
    %279 = arith.divf %277, %278 : vector<4x32xf32>
    %280 = vector.extract_strided_slice %62 {offsets = [28, 0], sizes = [4, 32], strides = [1, 1]} : vector<32x32xf32> to vector<4x32xf32>
    %281 = arith.addf %280, %269 : vector<4x32xf32>
    %282 = arith.negf %281 : vector<4x32xf32>
    %283 = math.exp %282 : vector<4x32xf32>
    %cst_103 = arith.constant 1.000000e+00 : f32
    %284 = vector.broadcast %cst_103 : f32 to vector<4x32xf32>
    %285 = arith.addf %284, %283 : vector<4x32xf32>
    %286 = arith.divf %284, %285 : vector<4x32xf32>
    %287 = vector.extract_strided_slice %67 {offsets = [28, 0], sizes = [4, 32], strides = [1, 1]} : vector<32x32xf32> to vector<4x32xf32>
    %288 = arith.mulf %279, %272 : vector<4x32xf32>
    %289 = arith.addf %287, %288 : vector<4x32xf32>
    %290 = math.tanh %289 : vector<4x32xf32>
    %cst_104 = arith.constant 1.000000e+00 : f32
    %291 = vector.broadcast %cst_104 : f32 to vector<4x32xf32>
    %292 = arith.subf %291, %286 : vector<4x32xf32>
    %293 = arith.mulf %292, %290 : vector<4x32xf32>
    %294 = arith.mulf %286, %267 : vector<4x32xf32>
    %295 = arith.addf %293, %294 : vector<4x32xf32>
    %296 = tpu.concatenate %99, %127, %155, %183, %211, %239, %267, %295 in 0 : vector<4x32xf32>, vector<4x32xf32>, vector<4x32xf32>, vector<4x32xf32>, vector<4x32xf32>, vector<4x32xf32>, vector<4x32xf32>, vector<4x32xf32> -> vector<32x32xf32>
    %c0_105 = arith.constant 0 : index
    %c0_106 = arith.constant 0 : index
    %297 = vector.load %arg24[%c0_105, %c0_106] : memref<32x64xf32, #tpu.memory_space<vmem>>, vector<32x64xf32>
    %cst_107 = arith.constant dense<0.000000e+00> : vector<32x64xf32>
    %298 = tpu.matmul %296, %297, %cst_107 {dimension_numbers = #tpu.dot_dimension_numbers<[1], [0], [0], [1], [0, 0, 1, 1], [], []>} : vector<32x32xf32>, vector<32x64xf32>, vector<32x64xf32> -> vector<32x64xf32>
    %c0_108 = arith.constant 0 : index
    %c0_109 = arith.constant 0 : index
    %299 = vector.load %arg25[%c0_108, %c0_109] : memref<1x64xf32, #tpu.memory_space<vmem>>, vector<1x64xf32>
    %300 = vector.broadcast %299 : vector<1x64xf32> to vector<32x64xf32>
    %301 = arith.addf %298, %300 : vector<32x64xf32>
    %302 = math.tanh %301 : vector<32x64xf32>
    %cst_110 = arith.constant dense<0xFF800000> : vector<32xf32>
    %303 = vector.multi_reduction <maximumf>, %302, %cst_110 [1] : vector<32x64xf32> to vector<32xf32>
    %304 = vector.shape_cast %303 : vector<32xf32> to vector<32x1xf32>
    %305 = vector.broadcast %304 : vector<32x1xf32> to vector<32x64xf32>
    %306 = arith.subf %302, %305 : vector<32x64xf32>
    %307 = math.exp %306 : vector<32x64xf32>
    %cst_111 = arith.constant dense<0.000000e+00> : vector<32xf32>
    %308 = vector.multi_reduction <add>, %307, %cst_111 [1] : vector<32x64xf32> to vector<32xf32>
    %309 = vector.shape_cast %308 : vector<32xf32> to vector<32x1xf32>
    %310 = math.log %309 : vector<32x1xf32>
    %311 = vector.broadcast %310 : vector<32x1xf32> to vector<32x64xf32>
    %312 = arith.subf %306, %311 : vector<32x64xf32>
    %313 = tpu.iota {dimensions = array<i32: 1>} : vector<32x64xi32>
    %c0_112 = arith.constant 0 : index
    %c0_113 = arith.constant 0 : index
    %314 = vector.load %arg4[%c0_112, %c0_113] : memref<32x1xi32, #tpu.memory_space<vmem>>, vector<32x1xi32>
    %315 = vector.broadcast %314 : vector<32x1xi32> to vector<32x64xi32>
    %316 = arith.cmpi eq, %313, %315 : vector<32x64xi32>
    %cst_114 = arith.constant 0.000000e+00 : f32
    %317 = vector.broadcast %cst_114 : f32 to vector<32x64xf32>
    %318 = arith.select %316, %312, %317 : vector<32x64xi1>, vector<32x64xf32>
    %cst_115 = arith.constant dense<0.000000e+00> : vector<32xf32>
    %319 = vector.multi_reduction <add>, %318, %cst_115 [1] : vector<32x64xf32> to vector<32xf32>
    %320 = vector.shape_cast %319 : vector<32xf32> to vector<32x1xf32>
    %321 = vector.shape_cast %320 : vector<32x1xf32> to vector<1x32x1xf32>
    %cst_116 = arith.constant dense<0.000000e+00> : vector<1xf32>
    %322 = vector.multi_reduction <add>, %321, %cst_116 [1, 2] : vector<1x32x1xf32> to vector<1xf32>
    %323 = vector.shape_cast %322 : vector<1xf32> to vector<1x1x1xf32>
    %324 = vector.extract %323[0, 0, 0] : f32 from vector<1x1x1xf32>
    %cst_117 = arith.constant 3.200000e+01 : f32
    %325 = arith.divf %324, %cst_117 : f32
    %cst_118 = arith.constant 0.000000e+00 : f32
    %326 = arith.subf %cst_118, %325 : f32
    %327 = vector.broadcast %52 : f32 to vector<1x1xf32>
    %328 = vector.broadcast %326 : f32 to vector<1x1xf32>
    %329 = tpu.concatenate %327, %328 in 1 : vector<1x1xf32>, vector<1x1xf32> -> vector<1x2xf32>
    %c0_119 = arith.constant 0 : index
    %c0_120 = arith.constant 0 : index
    %330 = vector.load %arg27[%c0_119, %c0_120] : memref<1x2xf32, #tpu.memory_space<vmem>>, vector<1x2xf32>
    tpu.vector_store %arg27[%c0_119, %c0_120], %329 {strides = array<i32>} : memref<1x2xf32, #tpu.memory_space<vmem>>, vector<1x2xf32>,
    return
  }
}

</mosaic_0001>

<bundles_post_ra>
// kernel: mrg_forward.1
= control target key start
LH: loop header
LB: loop body
LE: loop exit
PB: predicated region body
PF: predicated region fallthrough
CT: control target
= control target key end

     0   :  { %vm102_vm0 = vcmask 1041408   ;;  %v3940_v0 = vmov 0   ;;  %v3941_v2 = vmov 0.0   ;;  %vm3942_vm1 = vmmov 0   ;;  %s4836_s0 = inlined_call_operand.vmem [shape: s32[4,1], index: 0, kind: input, shape index: {}]   ;;  %s4837_s1 = inlined_call_operand.vmem [shape: s32[4,1], index: 1, kind: input, shape index: {}]   ;;  %s4838_s5 = inlined_call_operand.vmem [shape: f32[10,32], index: 5, kind: input, shape index: {}]   ;;  %s4839_s3 = inlined_call_operand.vmem [shape: s32[32,1], index: 3, kind: input, shape index: {}]   ;;  %s4840_s6 = inlined_call_operand.vmem [shape: f32[12,32], index: 6, kind: input, shape index: {}]   ;;  %s4841_s8 = inlined_call_operand.vmem [shape: f32[64,64], index: 8, kind: input, shape index: {}]   ;;  %s4842_s7 = inlined_call_operand.vmem [shape: f32[64,32], index: 7, kind: input, shape index: {}]   ;;  %s4843_s10 = inlined_call_operand.vmem [shape: f32[32,16], index: 10, kind: input, shape index: {}]   ;;  %s4844_s15 = inlined_call_operand.vmem [shape: f32[32,32], index: 15, kind: input, shape index: {}]   ;;  %s4845_s9 = inlined_call_operand.vmem [shape: f32[1,64], index: 9, kind: input, shape index: {}]   ;;  %s4846_s21 = inlined_call_operand.vmem [shape: f32[32,32], index: 21, kind: input, shape index: {}]   ;;  %s4847_s12 = inlined_call_operand.vmem [shape: f32[16,1], index: 12, kind: input, shape index: {}]   ;;  %s4848_s14 = inlined_call_operand.vmem [shape: f32[32,32], index: 14, kind: input, shape index: {}]   ;;  %s4849_s23 = inlined_call_operand.vmem [shape: f32[32,32], index: 23, kind: input, shape index: {}]   ;;  %s4850_s22 = inlined_call_operand.vmem [shape: f32[32,32], index: 22, kind: input, shape index: {}]   ;;  %s4851_s13 = inlined_call_operand.<no memory space> [shape: f32[1,1], index: 13, kind: input, shape index: {}]   ;;  %s4852_s11 = inlined_call_operand.vmem [shape: f32[1,16], index: 11, kind: input, shape index: {}]   ;;  %s4853_s18 = inlined_call_operand.vmem [shape: f32[1,32], index: 18, kind: input, shape index: {}]   ;;  %s4854_s16 = inlined_call_operand.vmem [shape: f32[32,32], index: 16, kind: input, shape index: {}]   ;;  %s4855_s2 = inlined_call_operand.vmem [shape: f32[4,1], index: 2, kind: input, shape index: {}]   ;;  %s4856_s26 = inlined_call_operand.vmem [shape: f32[4,1], index: 26, kind: output, shape index: {0}]   ;;  %s4857_s17 = inlined_call_operand.vmem [shape: f32[1,32], index: 17, kind: input, shape index: {}]   ;;  %s4858_s19 = inlined_call_operand.vmem [shape: f32[1,32], index: 19, kind: input, shape index: {}]   ;;  %s4859_s20 = inlined_call_operand.vmem [shape: f32[1,32], index: 20, kind: input, shape index: {}]   ;;  %s4860_s24 = inlined_call_operand.vmem [shape: f32[32,64], index: 24, kind: input, shape index: {}]   ;;  %s4861_s25 = inlined_call_operand.vmem [shape: f32[1,64], index: 25, kind: input, shape index: {}]   ;;  %s4862_s4 = inlined_call_operand.vmem [shape: s32[32,1], index: 4, kind: input, shape index: {}]   ;;  %s4863_s27 = inlined_call_operand.vmem [shape: f32[1,2], index: 27, kind: output, shape index: {1}]  }
   0x1   :  { %4873 = sst [smem:[#allocation3_spill]] %s4836_s0  ;;  %3826 = vset.pattern.permute.xlu0 %v3940_v0  ;;  %3424 = vmatprep.subr.mxu1 %v3941_v2  ;;  %v88_v8 = vlaneseq  ;;  %vm98_vm2 = vcmask 80896   ;;  %vm189_vm4 = vcmask 1043456   ;;  %vm185_vm5 = vcmask 97280  }
   0x2   :  { %4874 = sst [smem:[#allocation4_spill]] %s4837_s1  ;;  %3428 = vmatprep.mubr.msk.f32.mxu1 %vm3942_vm1, %v3941_v2  ;;  %3827 = vset.pattern.permute.xlu1 %v3940_v0  ;;  %vm401_vm7 = vcmask 261120   ;;  %vm299_vm8 = vcmask 523264   ;;  %vm586_vm13 = vcmask 130048   ;;  %vm660_vm14 = vcmask 3072  }
   0x3   :  { %4875 = sst [smem:[#allocation5_spill]] %s4838_s5  ;;  %v4108_v9 = vand.u32 127, %v88_v8  ;;  %v681_v8 = vld [vmem:[%s4848_s14 + $0x18] sm:$0xff] }
   0x4   :  { %4876 = sst [smem:[#allocation6_spill]] %s4839_s3 }
   0x5   :  { %4877 = sst [smem:[#allocation7_spill]] %s4840_s6 }
   0x6   :  { %4878 = sst [smem:[#allocation8_spill]] %s4841_s8 }
   0x7   :  { %4879 = sst [smem:[#allocation9_spill]] %s4842_s7 }
   0x8   :  { %4880 = sst [smem:[#allocation10_spill]] %s4843_s10 }
   0x9   :  { %4881 = sst [smem:[#allocation11_spill]] %s4844_s15 }
   0xa   :  { %4882 = sst [smem:[#allocation12_spill]] %s4845_s9 }
   0xb   :  { %4883 = sst [smem:[#allocation13_spill]] %s4846_s21 }
   0xc   :  { %4884 = sst [smem:[#allocation14_spill]] %s4847_s12  ;;  %s3943_s12 = smov 32  }
   0xd   :  { %s4885_s15 = sld [smem:[#allocation3_spill]] }
   0xe   :  { %s4886_s8 = sld [smem:[#allocation5_spill]] }
   0xf   :  { %s4887_s1 = sld [smem:[#allocation4_spill]] }
  0x10   :  { %s4888_s3 = sld [smem:[#allocation6_spill]] }
  0x11   :  { %s4889_s30 = sld [smem:[#allocation7_spill]] }
  0x12   :  { %s4890_s21 = sld [smem:[#allocation8_spill]] }
  0x13   :  { %v87_v1 = vld [vmem:[%s4885_s15] sm:$0xf]  ;;  %s4893_s6 = sld [smem:[#allocation11_spill]] }
  0x14   :  { %91 = vperm.xlu0 %3826, %v87_v1   ;;  %v97_v3 = vld [vmem:[%s4886_s8 + $0x8] sm:$0x3]  ;;  %v96_v4 = vld [vmem:[%s4886_s8] sm:$0xff]  ;;  %s4894_s9 = sld [smem:[#allocation12_spill]] }
  0x15   :  { %v176_v5 = vld [vmem:[%s4887_s1] sm:$0xf]  ;;  %3425 = vmatpush3.msk.msra.mxu1 %vm102_vm0, %v97_v3  ;;  %s4891_s1 = sld [smem:[#allocation9_spill]] }
  0x16   :  { %3426 = vmatprep.subr.mxu1 %v3941_v2  ;;  %v264_v6 = vld [vmem:[%s4888_s3 + $0x8] sm:$0xff]  ;;  %v266_v7 = vld [vmem:[%s4888_s3 + $0x18] sm:$0xff]  ;;  %v263_v36 = vld [vmem:[%s4888_s3] sm:$0xff]  ;;  %s4895_s5 = sld [smem:[#allocation13_spill]] }
  0x17   :  { %3427 = vmatpush3.msra.mxu1 %v96_v4  ;;  %v184_v11 = vld [vmem:[%s4889_s30 + $0x8] sm:$0xf]  ;;  %v183_v13 = vld [vmem:[%s4889_s30] sm:$0xff]  ;;  %v265_v37 = vld [vmem:[%s4888_s3 + $0x10] sm:$0xff]  ;;  %s3944_s3 = smov 96   ;;  %s4896_s8 = sld [smem:[#allocation14_spill]] }
  0x18   :  { %178 = vperm.xlu0 %3826, %v176_v5   ;;  %3431 = vmatprep.subr.mxu1 %v3941_v2  ;;  %v410_v16 = vld [vmem:[%s4890_s21 + $0x38] sm:$0xff]  ;;  %v409_v17 = vld [vmem:[%s4890_s21 + $0x30] sm:$0xff]  ;;  %v408_v18 = vld [vmem:[%s4890_s21 + $0x28] sm:$0xff] }
  0x19   :  { %v407_v19 = vld [vmem:[%s4890_s21 + $0x20] sm:$0xff]  ;;  %v406_v20 = vld [vmem:[%s4890_s21 + $0x18] sm:$0xff]  ;;  %v405_v21 = vld [vmem:[%s4890_s21 + $0x10] sm:$0xff] }
  0x1a   :  { %v404_v22 = vld [vmem:[%s4890_s21 + $0x8] sm:$0xff]  ;;  %v403_v24 = vld [vmem:[%s4890_s21] sm:$0xff]  ;;  %s4892_s21 = sld [smem:[#allocation10_spill]]  ;;  %v789_v52 = vld [vmem:[%s4893_s6 + $0x18] sm:$0xff] }
  0x1b   :  { %v298_v23 = vld [vmem:[%s4891_s1 + $0x38] sm:$0xff]  ;;  %v297_v25 = vld [vmem:[%s4891_s1 + $0x30] sm:$0xff]  ;;  %v296_v26 = vld [vmem:[%s4891_s1 + $0x28] sm:$0xff] }
  0x1c   :  { %271 = vperm.xlu0 %3826, %v264_v6   ;;  %3438 = vmatprep.subr.mxu0 %v298_v23  ;;  %v295_v27 = vld [vmem:[%s4891_s1 + $0x20] sm:$0xff]  ;;  %v294_v28 = vld [vmem:[%s4891_s1 + $0x18] sm:$0xff]  ;;  %v293_v29 = vld [vmem:[%s4891_s1 + $0x10] sm:$0xff] }
  0x1d   :  { %3439 = vmatpush3.msra.mxu0 %v298_v23  ;;  %v292_v31 = vld [vmem:[%s4891_s1 + $0x8] sm:$0xff]  ;;  %v291_v34 = vld [vmem:[%s4891_s1] sm:$0xff]  ;;  %v788_v59 = vld [vmem:[%s4893_s6 + $0x10] sm:$0xff] }
  0x1e   :  { %3440 = vmatprep.subr.mxu0 %v297_v25  ;;  %v3170_v53 = vld [vmem:[%s4894_s9] ss:$0 sm:$0xff]  ;;  %v787_v61 = vld [vmem:[%s4893_s6 + $0x8] sm:$0xff]  ;;  %v4250_v0 = vld [vmem:[%s4895_s5 + $0x18] sm:$0xff] }
  0x1f   :  { %3441 = vmatpush3.msra.mxu0 %v297_v25  ;;  %v786_v62 = vld [vmem:[%s4893_s6] sm:$0xff]  ;;  %v4260_v3 = vld [vmem:[%s4895_s5 + $0x10] sm:$0xff]  ;;  %v4269_v4 = vld [vmem:[%s4895_s5 + $0x8] sm:$0xff] }
  0x20   :  { %277 = vperm.xlu0 %3826, %v266_v7   ;;  %3442 = vmatprep.subr.mxu0 %v296_v26  ;;  %v495_v48 = vld [vmem:[%s4892_s21 + $0x18] sm:$0xff]  ;;  %v494_v49 = vld [vmem:[%s4892_s21 + $0x10] sm:$0xff]  ;;  %v493_v50 = vld [vmem:[%s4892_s21 + $0x8] sm:$0xff] }
  0x21   :  { %3443 = vmatpush3.msra.mxu0 %v296_v26  ;;  %v492_v51 = vld [vmem:[%s4892_s21] sm:$0xff]  ;;  %v578_v6 = vld [vmem:[%s4896_s8 + $0x8] sm:$0xff] }
  0x22   :  { %3444 = vmatprep.subr.mxu0 %v295_v27  ;;  %v4278_v5 = vld [vmem:[%s4895_s5] sm:$0xff] }
  0x23   :  { %3445 = vmatpush3.msra.mxu0 %v295_v27  ;;  %v577_v7 = vld [vmem:[%s4896_s8] sm:$0xff] }
  0x24   :  { %3446 = vmatprep.subr.mxu0 %v294_v28 }
  0x25   :  { %3447 = vmatpush3.msra.mxu0 %v294_v28 }
  0x26   :  { %3448 = vmatprep.subr.mxu0 %v293_v29 }
  0x27   :  { %3449 = vmatpush3.msra.mxu0 %v293_v29 }
  0x28   :  { %3450 = vmatprep.subr.mxu0 %v292_v31 }
  0x29   :  { %3451 = vmatpush3.msra.mxu0 %v292_v31  ;;  %v680_v31 = vld [vmem:[%s4848_s14 + $0x10] sm:$0xff] }
  0x2a   :  { %3452 = vmatprep.subr.mxu0 %v291_v34 }
  0x2b   :  { %3453 = vmatpush3.msra.mxu0 %v291_v34  ;;  %v885_v34 = vld [vmem:[%s4854_s16 + $0x18] sm:$0xff] }
  0x2c   :  { %3479 = vmatprep.subr.mxu0 %v3941_v2 }
  0x8f   :  { %v92_v10 = vpop.permute.xlu0 %91 }
  0x90   :  { %vm93_vm3 = vcmp.eq.s32.totalorder %v4108_v9, %v92_v10  ;;  %v4299_v10 = vld [vmem:[%s4849_s23 + $0x18] sm:$0xff] }
  0x91   :  { %v3156_v12 = vsel %vm93_vm3, 1.0, %v3941_v2  ;;  %vm3122_vm3 = vcmask 7168  }
  0x92   :  { %3429 = vmatmul.mubr.msk.f32.vlgmr.msra.gmra.mxu1 %vm98_vm2, %v3156_v12  ;;  %v4308_v12 = vld [vmem:[%s4849_s23 + $0x10] sm:$0xff] }
  0x93   :  { %3432 = vmatpush3.msk.msra.mxu1 %vm189_vm4, %v184_v11  ;;  %v179_v14 = vpop.permute.xlu0 %178  ;;  %3435 = vmatprep.mubr.msk.f32.mxu1 %vm3942_vm1, %v3941_v2 }
  0x94   :  { %3433 = vmatprep.subr.mxu1 %v3941_v2  ;;  %vm180_vm6 = vcmp.eq.s32.totalorder %v4108_v9, %v179_v14  ;;  %v4324_v14 = vld [vmem:[%s4849_s23] sm:$0xff] }
  0x95   :  { %v3159_v15 = vsel %vm180_vm6, 1.0, %v3941_v2  ;;  %3434 = vmatpush3.msra.mxu1 %v183_v13  ;;  %v4317_v13 = vld [vmem:[%s4849_s23 + $0x8] sm:$0xff] }
  0x96   :  { %3436 = vmatmul.mubr.msk.f32.vlgmr.msra.gmra.mxu1 %vm185_vm5, %v3159_v15  ;;  %3460 = vmatprep.subr.mxu1 %v3941_v2  ;;  %v4334_v15 = vld [vmem:[%s4850_s22 + $0x18] sm:$0xff] }
  0x97   :  { %3476 = vmatprep.mubr.msk.f32.mxu1 %vm3942_vm1, %v3941_v2  ;;  %3461 = vmatpush3.msra.mxu1 %v410_v16  ;;  %v272_v40 = vpop.permute.xlu0 %271  ;;  %v4343_v16 = vld [vmem:[%s4850_s22 + $0x10] sm:$0xff] }
  0x98   :  { %3462 = vmatprep.subr.mxu1 %v3941_v2  ;;  %vm280_vm9 = vcmp.eq.s32.totalorder %v4108_v9, %v272_v40 }
  0x99   :  { %3463 = vmatpush3.msra.mxu1 %v409_v17  ;;  %v3163_v44 = vsel %vm280_vm9, 1.0, %v3941_v2  ;;  %v4350_v17 = vld [vmem:[%s4850_s22 + $0x8] sm:$0xff] }
  0x9a   :  { %3464 = vmatprep.subr.mxu1 %v3941_v2 }
  0x9b   :  { %3465 = vmatpush3.msra.mxu1 %v408_v18  ;;  %v278_v42 = vpop.permute.xlu0 %277  ;;  %v4357_v18 = vld [vmem:[%s4850_s22] sm:$0xff] }
  0x9c   :  { %3466 = vmatprep.subr.mxu1 %v3941_v2  ;;  %vm282_vm11 = vcmp.eq.s32.totalorder %v4108_v9, %v278_v42 }
  0x9d   :  { %3467 = vmatpush3.msra.mxu1 %v407_v19  ;;  %v3165_v47 = vsel %vm282_vm11, 1.0, %v3941_v2  ;;  %v33_v19 = vstv %s4851_s13 }
  0x9e   :  { %3468 = vmatprep.subr.mxu1 %v3941_v2  ;;  %34 = vst [vmem:[#allocation2] sm:$0x1] %v33_v19 }
  0x9f   :  { %3469 = vmatpush3.msra.mxu1 %v406_v20  ;;  %v3172_v20 = vld [vmem:[%s4852_s11] ss:$0 sm:$0xff] }
  0xa0   :  { %3470 = vmatprep.subr.mxu1 %v3941_v2 }
  0xa1   :  { %3471 = vmatpush3.msra.mxu1 %v405_v21 }
  0xa2   :  { %3472 = vmatprep.subr.mxu1 %v3941_v2 }
  0xa3   :  { %3473 = vmatpush3.msra.mxu1 %v404_v22 }
  0xa4   :  { %3474 = vmatprep.subr.mxu1 %v3941_v2 }
  0xa5   :  { %3475 = vmatpush3.msra.mxu1 %v403_v24  ;;  %v4371_v24 = vld [vmem:[%s4853_s18] ss:$0 sm:$0xff] }
  0xa6   :  { %3490 = vmatprep.subr.mxu1 %v3941_v2 }
 0x152   :  { %v172_v30 = vpop.f32.mrf.mxu1 }
 0x154   :  { %v3430_v32 = vpop.f32.mrf.mxu1 }
 0x155   :  { %v679_v32 = vld [vmem:[%s4848_s14 + $0x8] sm:$0xff] }
 0x156   :  { %v259_v33 = vpop.f32.mrf.mxu1 }
 0x157   :  { %398 = vrot.lane.b32.xlu1 %v259_v33, %s3943_s12  ;;  %v678_v33 = vld [vmem:[%s4848_s14] sm:$0xff] }
 0x158   :  { %v3437_v35 = vpop.f32.mrf.mxu1 }
 0x159   :  { %v884_v35 = vld [vmem:[%s4854_s16 + $0x10] sm:$0xff] }
 0x15b   :  { %268 = vperm.xlu1 %3827, %v263_v36   ;;  %v883_v36 = vld [vmem:[%s4854_s16 + $0x8] sm:$0xff] }
 0x15f   :  { %274 = vperm.xlu1 %3827, %v265_v37   ;;  %v882_v37 = vld [vmem:[%s4854_s16] sm:$0xff] }
 0x1c9   :  { %v399_v38 = vpop.permute.xlu1 %398 }
 0x1ca   :  { %v402_v39 = vsel %vm401_vm7, %v172_v30, %v399_v38 }
 0x1cb   :  { %3477 = vmatmul.mubr.msk.f32.vlgmr.msra.gmra.mxu1 %vm299_vm8, %v402_v39 }
 0x1cc   :  { %3494 = vmatprep.mubr.msk.f32.mxu1 %vm3942_vm1, %v3941_v2  ;;  %3491 = vmatpush3.msra.mxu1 %v578_v6 }
 0x1cd   :  { %3492 = vmatprep.subr.mxu1 %v3941_v2 }
 0x1ce   :  { %3493 = vmatpush3.msra.mxu1 %v577_v7 }
 0x1cf   :  { %3497 = vmatprep.subr.mxu1 %v681_v8 }
 0x1d6   :  { %v269_v41 = vpop.permute.xlu1 %268 }
 0x1d7   :  { %vm279_vm10 = vcmp.eq.s32.totalorder %v4108_v9, %v269_v41 }
 0x1d8   :  { %v3162_v43 = vsel %vm279_vm10, 1.0, %v3941_v2 }
 0x1d9   :  { %3454 = vmatprep.mubr.msk.f32.mxu0 %vm299_vm8, %v3162_v43  ;;  %v3174_v43 = vld [vmem:[#allocation2] ss:$0 sm:$0xff] }
 0x1da   :  { %v275_v45 = vpop.permute.xlu1 %274  ;;  %3455 = vmatmul.mubr.msk.f32.vlgmr.msra.gmra.mxu0 %vm299_vm8, %v3163_v44 }
 0x1db   :  { %vm281_vm12 = vcmp.eq.s32.totalorder %v4108_v9, %v275_v45  ;;  %3480 = vmatpush3.msra.mxu0 %v495_v48  ;;  %v662_v45 = vld [vmem:[%s4855_s2] sm:$0xf] }
 0x1dc   :  { %v3164_v46 = vsel %vm281_vm12, 1.0, %v3941_v2  ;;  %3481 = vmatprep.subr.mxu0 %v3941_v2 }
 0x1dd   :  { %3457 = vmatprep.mubr.msk.f32.mxu0 %vm299_vm8, %v3164_v46  ;;  %3482 = vmatpush3.msra.mxu0 %v494_v49 }
 0x1de   :  { %3458 = vmatmul.mubr.msk.f32.gmra.mxu0 %vm299_vm8, %v3165_v47  ;;  %3483 = vmatprep.subr.mxu0 %v3941_v2 }
 0x1df   :  { %3487 = vmatprep.mubr.msk.f32.mxu0 %vm3942_vm1, %v3941_v2  ;;  %3484 = vmatpush3.msra.mxu0 %v493_v50  ;;  %v3176_v50 = vld [vmem:[%s4857_s17] ss:$0 sm:$0xff] }
 0x1e0   :  { %3485 = vmatprep.subr.mxu0 %v3941_v2 }
 0x1e1   :  { %3486 = vmatpush3.msra.mxu0 %v492_v51 }
 0x1e2   :  { %3511 = vmatprep.subr.mxu0 %v789_v52 }
 0x28b   :  { %v487_v54 = vpop.f32.mrf.mxu1 }
 0x28c   :  { %v488_v55 = vadd.f32 %v3170_v53, %v487_v54 }
 0x28d   :  { %v3478_v56 = vpop.f32.mrf.mxu1 }
 0x28e   :  { %3828 = vtanh.f32 %v488_v55  ;;  %992 = vrot.lane.b32.xlu1 %v488_v55, %s3944_s3 }
 0x29a   :  { %v4229_v57 = vpop.f32.mrf.mxu0 }
 0x29b   :  { %v3829_v58 = vpop.eup %3828 }
 0x29c   :  { %v4234_v60 = vpop.f32.mrf.mxu0  ;;  %3488 = vmatmul.mubr.msk.f32.vlgmr.msra.gmra.mxu0 %vm401_vm7, %v3829_v58 }
 0x29d   :  { %3512 = vmatpush3.msra.mxu0 %v789_v52  ;;  %3519 = vmatprep.mubr.msk.f32.mxu0 %vm401_vm7, %v4234_v60 }
 0x29e   :  { %3513 = vmatprep.subr.mxu0 %v788_v59  ;;  %v4245_v63 = vpop.f32.mrf.mxu0 }
 0x29f   :  { %3514 = vmatpush3.msra.mxu0 %v788_v59 }
 0x2a0   :  { %3515 = vmatprep.subr.mxu0 %v787_v61  ;;  %v4252_v1 = vpop.f32.mrf.mxu0 }
 0x2a1   :  { %3516 = vmatpush3.msra.mxu0 %v787_v61 }
 0x2a2   :  { %3517 = vmatprep.subr.mxu0 %v786_v62 }
 0x2a3   :  { %3518 = vmatpush3.msra.mxu0 %v786_v62 }
 0x2a4   :  { %3520 = vmatmul.mubr.msk.f32.vlgmr.msra.gmra.mxu0 %vm401_vm7, %v4229_v57  ;;  %3539 = vmatprep.subr.mxu0 %v3941_v2 }
 0x2a5   :  { %3522 = vmatprep.mubr.msk.f32.mxu0 %vm401_vm7, %v4252_v1  ;;  %3540 = vmatpush3.msra.mxu0 %v4250_v0 }
 0x2a6   :  { %3541 = vmatprep.subr.mxu0 %v3941_v2 }
 0x2a7   :  { %3542 = vmatpush3.msra.mxu0 %v4260_v3 }
 0x2a8   :  { %3523 = vmatmul.mubr.msk.f32.gmra.mxu0 %vm401_vm7, %v4245_v63  ;;  %3543 = vmatprep.subr.mxu0 %v3941_v2 }
 0x2a9   :  { %3544 = vmatpush3.msra.mxu0 %v4269_v4  ;;  %3547 = vmatprep.mubr.msk.f32.mxu0 %vm3942_vm1, %v3941_v2 }
 0x2aa   :  { %3545 = vmatprep.subr.mxu0 %v3941_v2 }
 0x2ab   :  { %3546 = vmatpush3.msra.mxu0 %v4278_v5 }
 0x2ac   :  { %3561 = vmatprep.subr.mxu0 %v3941_v2 }
 0x300   :  { %v4301_v11 = vpop.permute.xlu1 %992 }
 0x301   :  { %3548 = vmatmul.mubr.msk.f32.vlgmr.msra.gmra.mxu0 %vm401_vm7, %v4301_v11 }
 0x302   :  { %3562 = vmatpush3.msra.mxu0 %v4299_v10  ;;  %3569 = vmatprep.mubr.msk.f32.mxu0 %vm3942_vm1, %v3941_v2 }
 0x303   :  { %3563 = vmatprep.subr.mxu0 %v3941_v2 }
 0x304   :  { %3564 = vmatpush3.msra.mxu0 %v4308_v12 }
 0x305   :  { %3565 = vmatprep.subr.mxu0 %v3941_v2 }
 0x306   :  { %3566 = vmatpush3.msra.mxu0 %v4317_v13 }
 0x307   :  { %3567 = vmatprep.subr.mxu0 %v3941_v2 }
 0x308   :  { %3568 = vmatpush3.msra.mxu0 %v4324_v14 }
 0x309   :  { %3570 = vmatmul.mubr.msk.f32.vlgmr.msra.gmra.mxu0 %vm401_vm7, %v4301_v11  ;;  %3583 = vmatprep.subr.mxu0 %v3941_v2 }
 0x30a   :  { %3584 = vmatpush3.msra.mxu0 %v4334_v15  ;;  %3591 = vmatprep.mubr.msk.f32.mxu0 %vm3942_vm1, %v3941_v2 }
 0x30b   :  { %3585 = vmatprep.subr.mxu0 %v3941_v2 }
 0x30c   :  { %3586 = vmatpush3.msra.mxu0 %v4343_v16 }
 0x30d   :  { %3587 = vmatprep.subr.mxu0 %v3941_v2 }
 0x30e   :  { %3588 = vmatpush3.msra.mxu0 %v4350_v17 }
 0x30f   :  { %3589 = vmatprep.subr.mxu0 %v3941_v2 }
 0x310   :  { %3590 = vmatpush3.msra.mxu0 %v4357_v18 }
 0x311   :  { %3605 = vmatprep.subr.mxu0 %v3941_v2 }
 0x35c   :  { %v572_v21 = vpop.f32.mrf.mxu0 }
 0x35d   :  { %v573_v22 = vadd.f32 %v3172_v20, %v572_v21 }
 0x35e   :  { %v3489_v23 = vpop.f32.mrf.mxu0 }
 0x35f   :  { %3830 = vtanh.f32 %v573_v22 }
 0x364   :  { %v3521_v25 = vpop.f32.mrf.mxu0 }
 0x365   :  { %v4374_v26 = vadd.f32 %v3521_v25, %v4371_v24 }
 0x366   :  { %v4376_v27 = vpop.f32.mrf.mxu0 }
 0x367   :  { %v4472_v20 = vadd.f32 %v4371_v24, %v4376_v27 }
 0x368   :  { %v3524_v28 = vpop.f32.mrf.mxu0 }
 0x369   :  { %v4379_v29 = vadd.f32 %v3524_v28, %v4371_v24 }
 0x36a   :  { %v4441_v38 = vpop.f32.mrf.mxu0 }
 0x36c   :  { %v3831_v30 = vpop.eup %3830 }
 0x36d   :  { %3495 = vmatmul.mubr.msk.f32.vlgmr.msra.gmra.mxu1 %vm586_vm13, %v3831_v30 }
 0x36e   :  { %3498 = vmatpush3.msra.mxu1 %v681_v8  ;;  %3505 = vmatprep.mubr.msk.f32.mxu1 %vm401_vm7, %v4234_v60 }
 0x36f   :  { %3499 = vmatprep.subr.mxu1 %v680_v31 }
 0x370   :  { %3500 = vmatpush3.msra.mxu1 %v680_v31 }
 0x371   :  { %3501 = vmatprep.subr.mxu1 %v679_v32 }
 0x372   :  { %3502 = vmatpush3.msra.mxu1 %v679_v32 }
 0x373   :  { %3503 = vmatprep.subr.mxu1 %v678_v33 }
 0x374   :  { %3504 = vmatpush3.msra.mxu1 %v678_v33  ;;  %v4480_v33 = vld [vmem:[%s4859_s20] ss:$0 sm:$0xff] }
 0x375   :  { %3506 = vmatmul.mubr.msk.f32.vlgmr.msra.gmra.mxu1 %vm401_vm7, %v4229_v57  ;;  %3525 = vmatprep.subr.mxu1 %v885_v34 }
 0x376   :  { %3508 = vmatprep.mubr.msk.f32.mxu1 %vm401_vm7, %v4252_v1  ;;  %3526 = vmatpush3.msra.mxu1 %v885_v34 }
 0x377   :  { %3527 = vmatprep.subr.mxu1 %v884_v35 }
 0x378   :  { %3528 = vmatpush3.msra.mxu1 %v884_v35 }
 0x379   :  { %3509 = vmatmul.mubr.msk.f32.gmra.mxu1 %vm401_vm7, %v4245_v63  ;;  %3529 = vmatprep.subr.mxu1 %v883_v36 }
 0x37a   :  { %3530 = vmatpush3.msra.mxu1 %v883_v36  ;;  %3533 = vmatprep.mubr.msk.f32.mxu1 %vm401_vm7, %v4234_v60  ;;  %v3186_v60 = vld [vmem:[%s4858_s19] ss:$0 sm:$0xff] }
 0x37b   :  { %3531 = vmatprep.subr.mxu1 %v882_v37 }
 0x37c   :  { %3532 = vmatpush3.msra.mxu1 %v882_v37 }
 0x37d   :  { %3534 = vmatmul.mubr.msk.f32.vlgmr.msra.gmra.mxu1 %vm401_vm7, %v4229_v57  ;;  %3550 = vmatprep.subr.mxu1 %v3941_v2 }
 0x37e   :  { %3536 = vmatprep.mubr.msk.f32.mxu1 %vm401_vm7, %v4252_v1  ;;  %3551 = vmatpush3.msra.mxu1 %v4334_v15 }
 0x37f   :  { %3552 = vmatprep.subr.mxu1 %v3941_v2 }
 0x380   :  { %3553 = vmatpush3.msra.mxu1 %v4343_v16 }
 0x381   :  { %3537 = vmatmul.mubr.msk.f32.gmra.mxu1 %vm401_vm7, %v4245_v63  ;;  %3554 = vmatprep.subr.mxu1 %v3941_v2 }
 0x382   :  { %3555 = vmatpush3.msra.mxu1 %v4350_v17  ;;  %3558 = vmatprep.mubr.msk.f32.mxu1 %vm3942_vm1, %v3941_v2 }
 0x383   :  { %3556 = vmatprep.subr.mxu1 %v3941_v2 }
 0x384   :  { %3557 = vmatpush3.msra.mxu1 %v4357_v18 }
 0x385   :  { %3559 = vmatmul.mubr.msk.f32.vlgmr.msra.gmra.mxu1 %vm401_vm7, %v4301_v11  ;;  %3572 = vmatprep.subr.mxu1 %v3941_v2 }
 0x386   :  { %3573 = vmatpush3.msra.mxu1 %v4250_v0  ;;  %3580 = vmatprep.mubr.msk.f32.mxu1 %vm3942_vm1, %v3941_v2 }
 0x387   :  { %3574 = vmatprep.subr.mxu1 %v3941_v2 }
 0x388   :  { %3575 = vmatpush3.msra.mxu1 %v4260_v3 }
 0x389   :  { %3576 = vmatprep.subr.mxu1 %v3941_v2 }
 0x38a   :  { %3577 = vmatpush3.msra.mxu1 %v4269_v4 }
 0x38b   :  { %3578 = vmatprep.subr.mxu1 %v3941_v2 }
 0x38c   :  { %3579 = vmatpush3.msra.mxu1 %v4278_v5 }
 0x38d   :  { %3594 = vmatprep.subr.mxu1 %v3941_v2 }
 0x3c1   :  { %v1062_v39 = vpop.f32.mrf.mxu0 }
 0x3c3   :  { %v3549_v40 = vpop.f32.mrf.mxu0 }
 0x3c9   :  { %v1208_v41 = vpop.f32.mrf.mxu0 }
 0x3ca   :  { %v1209_v27 = vadd.f32 %v4480_v33, %v1208_v41 }
 0x3cb   :  { %v3571_v42 = vpop.f32.mrf.mxu0 }
 0x42d   :  { %v656_v44 = vpop.f32.mrf.mxu1 }
 0x42e   :  { %v657_v46 = vadd.f32 %v3174_v43, %v656_v44 }
 0x42f   :  { %v3496_v47 = vpop.f32.mrf.mxu1 }
 0x430   :  { %v663_v48 = vsub.f32 %v657_v46, %v662_v45  ;;  %661 = vst.msk [vmem:[%s4856_s26] sm:$0xf] %vm660_vm14, %v657_v46 }
 0x432   :  { %v664_v49 = vmul.f32 %v663_v48, %v663_v48 }
 0x434   :  { %v4452_v51 = vsel %vm660_vm14, %v664_v49, 0.0 }
 0x435   :  { %v3507_v52 = vpop.f32.mrf.mxu1 }
 0x436   :  { %v4454_v53 = vadd.f32 %v3507_v52, %v3176_v50 }
 0x437   :  { %v767_v54 = vpop.f32.mrf.mxu1 }
 0x438   :  { %v4456_v55 = vadd.f32 %v3176_v50, %v767_v54 }
 0x439   :  { %v3510_v56 = vpop.f32.mrf.mxu1 }
 0x43a   :  { %v1212_v57 = vadd.f32 %v1062_v39, %v4456_v55  ;;  %v4459_v58 = vadd.f32 %v3510_v56, %v3176_v50 }
 0x43b   :  { %v777_v59 = vpop.f32.mrf.mxu1 }
 0x43c   :  { %v3195_v61 = vmul.f32 -1.442695, %v1212_v57  ;;  %v4464_v62 = vadd.f32 %v3176_v50, %v777_v59 }
 0x43d   :  { %v3535_v63 = vpop.f32.mrf.mxu1 }
 0x43e   :  { %3832 = vpow2.f32 %v3195_v61  ;;  %v4466_v1 = vadd.f32 %v3535_v63, %v3186_v60 }
 0x43f   :  { %v959_v6 = vpop.f32.mrf.mxu1 }
 0x440   :  { %v4483_v36 = vadd.f32 %v3186_v60, %v959_v6 }
 0x441   :  { %v3538_v7 = vpop.f32.mrf.mxu1 }
 0x442   :  { %v4468_v8 = vadd.f32 %v3538_v7, %v3186_v60 }
 0x443   :  { %v969_v19 = vpop.f32.mrf.mxu1 }
 0x444   :  { %v4474_v21 = vadd.f32 %v3186_v60, %v969_v19 }
 0x445   :  { %v1132_v22 = vpop.f32.mrf.mxu1 }
 0x446   :  { %v1219_v23 = vadd.f32 %v1132_v22, %v4472_v20 }
 0x447   :  { %v3560_v25 = vpop.f32.mrf.mxu1 }
 0x448   :  { %v3196_v28 = vmul.f32 -1.442695, %v1219_v23 }
 0x44a   :  { %3834 = vpow2.f32 %v3196_v28 }
 0x44b   :  { %v3833_v30 = vpop.eup %3832 }
 0x44c   :  { %v1216_v31 = vadd.f32 1.0, %v3833_v30 }
 0x44e   :  { %3836 = vrcp.f32 %v1216_v31 }
 0x457   :  { %v3835_v32 = vpop.eup %3834 }
 0x458   :  { %v1223_v34 = vadd.f32 1.0, %v3835_v32 }
 0x45a   :  { %3838 = vrcp.f32 %v1223_v34 }
 0x45b   :  { %v3837_v35 = vpop.eup %3836 }
 0x45c   :  { %v1226_v37 = vmul.f32 %v3837_v35, %v1209_v27 }
 0x45e   :  { %v1227_v39 = vadd.f32 %v1226_v37, %v4483_v36 }
 0x460   :  { %3840 = vtanh.f32 %v1227_v39 }
 0x467   :  { %v3839_v40 = vpop.eup %3838 }
 0x468   :  { %v1229_v42 = vsub.f32 1.0, %v3839_v40  ;;  %v1232_v45 = vmul.f32 %v3839_v40, %v4301_v11 }
 0x46d   :  { %v3841_v43 = vpop.eup %3840 }
 0x46e   :  { %v1230_v44 = vmul.f32 %v3841_v43, %v1229_v42 }
 0x470   :  { %v4487_v46 = vadd.f32 %v1232_v45, %v1230_v44 }
 0x472   :  { %3581 = vmatmul.mubr.msk.f32.vlgmr.msra.gmra.mxu1 %vm401_vm7, %v4487_v46  ;;  %3592 = vmatmul.mubr.msk.f32.vlgmr.msra.gmra.mxu0 %vm401_vm7, %v4487_v46 }
 0x473   :  { %3595 = vmatpush3.msra.mxu1 %v4299_v10  ;;  %3602 = vmatprep.mubr.msk.f32.mxu1 %vm3942_vm1, %v3941_v2 }
 0x474   :  { %3596 = vmatprep.subr.mxu1 %v3941_v2  ;;  %3606 = vmatpush3.msra.mxu0 %v4250_v0 }
 0x475   :  { %3597 = vmatpush3.msra.mxu1 %v4308_v12  ;;  %3607 = vmatprep.subr.mxu0 %v3941_v2 }
 0x476   :  { %3598 = vmatprep.subr.mxu1 %v3941_v2  ;;  %3608 = vmatpush3.msra.mxu0 %v4260_v3 }
 0x477   :  { %3599 = vmatpush3.msra.mxu1 %v4317_v13  ;;  %3609 = vmatprep.subr.mxu0 %v3941_v2 }
 0x478   :  { %3600 = vmatprep.subr.mxu1 %v3941_v2  ;;  %3610 = vmatpush3.msra.mxu0 %v4269_v4 }
 0x479   :  { %3601 = vmatpush3.msra.mxu1 %v4324_v14  ;;  %3611 = vmatprep.subr.mxu0 %v3941_v2 }
 0x47a   :  { %3603 = vmatmul.mubr.msk.f32.vlgmr.msra.gmra.mxu1 %vm401_vm7, %v4487_v46  ;;  %3616 = vmatprep.subr.mxu1 %v3941_v2 }
 0x47b   :  { %3617 = vmatpush3.msra.mxu1 %v4334_v15  ;;  %3612 = vmatpush3.msra.mxu0 %v4278_v5 }
 0x47c   :  { %3618 = vmatprep.subr.mxu1 %v3941_v2  ;;  %3613 = vmatprep.mubr.msk.f32.mxu0 %vm3942_vm1, %v3941_v2 }
 0x47d   :  { %3619 = vmatpush3.msra.mxu1 %v4343_v16  ;;  %3624 = vmatprep.mubr.msk.f32.mxu1 %vm3942_vm1, %v3941_v2 }
 0x47e   :  { %3620 = vmatprep.subr.mxu1 %v3941_v2  ;;  %3627 = vmatprep.subr.mxu0 %v3941_v2 }
 0x47f   :  { %3621 = vmatpush3.msra.mxu1 %v4350_v17 }
 0x480   :  { %3622 = vmatprep.subr.mxu1 %v3941_v2 }
 0x481   :  { %3623 = vmatpush3.msra.mxu1 %v4357_v18 }
 0x482   :  { %3638 = vmatprep.subr.mxu1 %v3941_v2 }
 0x532   :  { %v1303_v11 = vpop.f32.mrf.mxu1  ;;  %v1373_v41 = vpop.f32.mrf.mxu0 }
 0x533   :  { %v1448_v47 = vrot.slane %v1303_v11, 4  ;;  %v1458_v54 = vrot.slane %v1373_v41, 4 }
 0x534   :  { %v3582_v48 = vpop.f32.mrf.mxu1  ;;  %v3593_v49 = vpop.f32.mrf.mxu0 }
 0x535   :  { %v1450_v50 = vadd.f32 %v1448_v47, %v4456_v55  ;;  %v1460_v57 = vadd.f32 %v1458_v54, %v4472_v20  ;;  %v1475_v20 = vrot.slane %v4487_v46, 4 }
 0x537   :  { %v3200_v52 = vmul.f32 -1.442695, %v1450_v50  ;;  %v3201_v60 = vmul.f32 -1.442695, %v1460_v57 }
 0x539   :  { %3842 = vpow2.f32 %v3200_v52 }
 0x53a   :  { %v1443_v56 = vpop.f32.mrf.mxu1  ;;  %3844 = vpow2.f32 %v3201_v60 }
 0x53b   :  { %v1444_v7 = vadd.f32 %v4480_v33, %v1443_v56 }
 0x53c   :  { %v3604_v59 = vpop.f32.mrf.mxu1 }
 0x53d   :  { %v1468_v22 = vrot.slane %v1444_v7, 4 }
 0x546   :  { %v3843_v61 = vpop.eup %3842 }
 0x547   :  { %v1454_v63 = vadd.f32 1.0, %v3843_v61  ;;  %v3845_v6 = vpop.eup %3844 }
 0x548   :  { %v1464_v19 = vadd.f32 1.0, %v3845_v6 }
 0x549   :  { %3846 = vrcp.f32 %v1454_v63 }
 0x54a   :  { %3848 = vrcp.f32 %v1464_v19 }
 0x556   :  { %v3847_v23 = vpop.eup %3846 }
 0x557   :  { %v1470_v55 = vmul.f32 %v3847_v23, %v1468_v22  ;;  %v3849_v28 = vpop.eup %3848 }
 0x558   :  { %v1473_v30 = vsub.f32 1.0, %v3849_v28  ;;  %v1477_v34 = vmul.f32 %v3849_v28, %v1475_v20 }
 0x559   :  { %v1471_v25 = vadd.f32 %v1470_v55, %v4483_v36 }
 0x55b   :  { %3850 = vtanh.f32 %v1471_v25 }
 0x568   :  { %v3851_v31 = vpop.eup %3850 }
 0x569   :  { %v1474_v32 = vmul.f32 %v3851_v31, %v1473_v30 }
 0x56b   :  { %v4530_v27 = vadd.f32 %v1477_v34, %v1474_v32 }
 0x56d   :  { %v1480_v35 = vrot.slane %v4530_v27, 4 }
 0x56f   :  { %3614 = vmatmul.mubr.msk.f32.vlgmr.msra.gmra.mxu0 %vm401_vm7, %v1480_v35  ;;  %3625 = vmatmul.mubr.msk.f32.vlgmr.msra.gmra.mxu1 %vm401_vm7, %v1480_v35 }
 0x570   :  { %3628 = vmatpush3.msra.mxu0 %v4299_v10  ;;  %3635 = vmatprep.mubr.msk.f32.mxu0 %vm3942_vm1, %v3941_v2 }
 0x571   :  { %3629 = vmatprep.subr.mxu0 %v3941_v2  ;;  %3639 = vmatpush3.msra.mxu1 %v4250_v0 }
 0x572   :  { %3630 = vmatpush3.msra.mxu0 %v4308_v12  ;;  %3640 = vmatprep.subr.mxu1 %v3941_v2 }
 0x573   :  { %3631 = vmatprep.subr.mxu0 %v3941_v2  ;;  %3641 = vmatpush3.msra.mxu1 %v4260_v3 }
 0x574   :  { %3632 = vmatpush3.msra.mxu0 %v4317_v13  ;;  %3642 = vmatprep.subr.mxu1 %v3941_v2 }
 0x575   :  { %3633 = vmatprep.subr.mxu0 %v3941_v2  ;;  %3643 = vmatpush3.msra.mxu1 %v4269_v4 }
 0x576   :  { %3634 = vmatpush3.msra.mxu0 %v4324_v14  ;;  %3644 = vmatprep.subr.mxu1 %v3941_v2 }
 0x577   :  { %3636 = vmatmul.mubr.msk.f32.vlgmr.msra.gmra.mxu0 %vm401_vm7, %v1480_v35  ;;  %3649 = vmatprep.subr.mxu0 %v3941_v2 }
 0x578   :  { %3650 = vmatpush3.msra.mxu0 %v4334_v15  ;;  %3645 = vmatpush3.msra.mxu1 %v4278_v5 }
 0x579   :  { %3651 = vmatprep.subr.mxu0 %v3941_v2  ;;  %3646 = vmatprep.mubr.msk.f32.mxu1 %vm3942_vm1, %v3941_v2 }
 0x57a   :  { %3652 = vmatpush3.msra.mxu0 %v4343_v16  ;;  %3657 = vmatprep.mubr.msk.f32.mxu0 %vm3942_vm1, %v3941_v2 }
 0x57b   :  { %3653 = vmatprep.subr.mxu0 %v3941_v2  ;;  %3660 = vmatprep.subr.mxu1 %v3941_v2 }
 0x57c   :  { %3654 = vmatpush3.msra.mxu0 %v4350_v17 }
 0x57d   :  { %3655 = vmatprep.subr.mxu0 %v3941_v2 }
 0x57e   :  { %3656 = vmatpush3.msra.mxu0 %v4357_v18 }
 0x57f   :  { %3671 = vmatprep.subr.mxu0 %v3941_v2 }
 0x62f   :  { %v1549_v36 = vpop.f32.mrf.mxu0  ;;  %v1619_v37 = vpop.f32.mrf.mxu1 }
 0x630   :  { %v1693_v39 = vadd.f32 %v1549_v36, %v4454_v53  ;;  %v1700_v44 = vadd.f32 %v1619_v37, %v4374_v26 }
 0x631   :  { %v3615_v40 = vpop.f32.mrf.mxu0  ;;  %v3626_v42 = vpop.f32.mrf.mxu1 }
 0x632   :  { %v3205_v43 = vmul.f32 -1.442695, %v1693_v39  ;;  %v3206_v41 = vmul.f32 -1.442695, %v1700_v44 }
 0x634   :  { %3852 = vpow2.f32 %v3205_v43 }
 0x635   :  { %3854 = vpow2.f32 %v3206_v41 }
 0x637   :  { %v1689_v45 = vpop.f32.mrf.mxu0 }
 0x638   :  { %v1690_v52 = vadd.f32 %v4480_v33, %v1689_v45 }
 0x639   :  { %v3637_v11 = vpop.f32.mrf.mxu0 }
 0x641   :  { %v3853_v47 = vpop.eup %3852 }
 0x642   :  { %v1697_v48 = vadd.f32 1.0, %v3853_v47  ;;  %v3855_v49 = vpop.eup %3854 }
 0x643   :  { %v1704_v50 = vadd.f32 1.0, %v3855_v49 }
 0x644   :  { %3856 = vrcp.f32 %v1697_v48 }
 0x645   :  { %3858 = vrcp.f32 %v1704_v50 }
 0x651   :  { %v3857_v54 = vpop.eup %3856 }
 0x652   :  { %v1707_v56 = vmul.f32 %v3857_v54, %v1690_v52  ;;  %v3859_v59 = vpop.eup %3858 }
 0x653   :  { %v1710_v60 = vsub.f32 1.0, %v3859_v59  ;;  %v1713_v6 = vmul.f32 %v3859_v59, %v1480_v35 }
 0x654   :  { %v1708_v57 = vadd.f32 %v1707_v56, %v4466_v1 }
 0x656   :  { %3860 = vtanh.f32 %v1708_v57 }
 0x663   :  { %v3861_v61 = vpop.eup %3860 }
 0x664   :  { %v1711_v63 = vmul.f32 %v3861_v61, %v1710_v60  ;;  %v4652_v61 = vadd.f32 %v4371_v24, %v4441_v38 }
 0x666   :  { %v4570_v7 = vadd.f32 %v1713_v6, %v1711_v63 }
 0x668   :  { %3647 = vmatmul.mubr.msk.f32.vlgmr.msra.gmra.mxu1 %vm401_vm7, %v4570_v7  ;;  %3658 = vmatmul.mubr.msk.f32.vlgmr.msra.gmra.mxu0 %vm401_vm7, %v4570_v7 }
 0x669   :  { %3661 = vmatpush3.msra.mxu1 %v4299_v10  ;;  %3668 = vmatprep.mubr.msk.f32.mxu1 %vm3942_vm1, %v3941_v2 }
 0x66a   :  { %3662 = vmatprep.subr.mxu1 %v3941_v2  ;;  %3672 = vmatpush3.msra.mxu0 %v4250_v0 }
 0x66b   :  { %3663 = vmatpush3.msra.mxu1 %v4308_v12  ;;  %3673 = vmatprep.subr.mxu0 %v3941_v2 }
 0x66c   :  { %3664 = vmatprep.subr.mxu1 %v3941_v2  ;;  %3674 = vmatpush3.msra.mxu0 %v4260_v3 }
 0x66d   :  { %3665 = vmatpush3.msra.mxu1 %v4317_v13  ;;  %3675 = vmatprep.subr.mxu0 %v3941_v2 }
 0x66e   :  { %3666 = vmatprep.subr.mxu1 %v3941_v2  ;;  %3676 = vmatpush3.msra.mxu0 %v4269_v4 }
 0x66f   :  { %3667 = vmatpush3.msra.mxu1 %v4324_v14  ;;  %3677 = vmatprep.subr.mxu0 %v3941_v2 }
 0x670   :  { %3669 = vmatmul.mubr.msk.f32.vlgmr.msra.gmra.mxu1 %vm401_vm7, %v4570_v7  ;;  %3682 = vmatprep.subr.mxu1 %v3941_v2 }
 0x671   :  { %3683 = vmatpush3.msra.mxu1 %v4334_v15  ;;  %3678 = vmatpush3.msra.mxu0 %v4278_v5 }
 0x672   :  { %3684 = vmatprep.subr.mxu1 %v3941_v2  ;;  %3679 = vmatprep.mubr.msk.f32.mxu0 %vm3942_vm1, %v3941_v2 }
 0x673   :  { %3685 = vmatpush3.msra.mxu1 %v4343_v16  ;;  %3690 = vmatprep.mubr.msk.f32.mxu1 %vm3942_vm1, %v3941_v2 }
 0x674   :  { %3686 = vmatprep.subr.mxu1 %v3941_v2  ;;  %3693 = vmatprep.subr.mxu0 %v3941_v2 }
 0x675   :  { %3687 = vmatpush3.msra.mxu1 %v4350_v17 }
 0x676   :  { %3688 = vmatprep.subr.mxu1 %v3941_v2 }
 0x677   :  { %3689 = vmatpush3.msra.mxu1 %v4357_v18 }
 0x678   :  { %3704 = vmatprep.subr.mxu1 %v3941_v2 }
 0x728   :  { %v1784_v19 = vpop.f32.mrf.mxu1  ;;  %v1854_v22 = vpop.f32.mrf.mxu0 }
 0x729   :  { %v1929_v23 = vrot.slane %v1784_v19, 4  ;;  %v1939_v20 = vrot.slane %v1854_v22, 4 }
 0x72a   :  { %v3648_v55 = vpop.f32.mrf.mxu1  ;;  %v3659_v25 = vpop.f32.mrf.mxu0 }
 0x72b   :  { %v1931_v28 = vadd.f32 %v1929_v23, %v4454_v53  ;;  %v1941_v32 = vadd.f32 %v1939_v20, %v4374_v26  ;;  %v1956_v26 = vrot.slane %v4570_v7, 4 }
 0x72d   :  { %v3210_v30 = vmul.f32 -1.442695, %v1931_v28  ;;  %v3211_v35 = vmul.f32 -1.442695, %v1941_v32 }
 0x72f   :  { %3862 = vpow2.f32 %v3210_v30 }
 0x730   :  { %v1924_v31 = vpop.f32.mrf.mxu1  ;;  %3864 = vpow2.f32 %v3211_v35 }
 0x731   :  { %v1925_v40 = vadd.f32 %v4480_v33, %v1924_v31 }
 0x732   :  { %v3670_v34 = vpop.f32.mrf.mxu1 }
 0x733   :  { %v1949_v43 = vrot.slane %v1925_v40, 4 }
 0x73c   :  { %v3863_v36 = vpop.eup %3862 }
 0x73d   :  { %v1935_v37 = vadd.f32 1.0, %v3863_v36  ;;  %v3865_v39 = vpop.eup %3864 }
 0x73e   :  { %v1945_v42 = vadd.f32 1.0, %v3865_v39 }
 0x73f   :  { %3866 = vrcp.f32 %v1935_v37 }
 0x740   :  { %3868 = vrcp.f32 %v1945_v42 }
 0x74c   :  { %v3867_v44 = vpop.eup %3866 }
 0x74d   :  { %v1951_v53 = vmul.f32 %v3867_v44, %v1949_v43  ;;  %v3869_v11 = vpop.eup %3868 }
 0x74e   :  { %v1954_v41 = vsub.f32 1.0, %v3869_v11  ;;  %v1958_v49 = vmul.f32 %v3869_v11, %v1956_v26 }
 0x74f   :  { %v1952_v45 = vadd.f32 %v1951_v53, %v4466_v1 }
 0x751   :  { %3870 = vtanh.f32 %v1952_v45 }
 0x75e   :  { %v3871_v47 = vpop.eup %3870 }
 0x75f   :  { %v1955_v48 = vmul.f32 %v3871_v47, %v1954_v41 }
 0x761   :  { %v4613_v50 = vadd.f32 %v1958_v49, %v1955_v48 }
 0x763   :  { %v1961_v52 = vrot.slane %v4613_v50, 4 }
 0x765   :  { %3680 = vmatmul.mubr.msk.f32.vlgmr.msra.gmra.mxu0 %vm401_vm7, %v1961_v52  ;;  %3691 = vmatmul.mubr.msk.f32.vlgmr.msra.gmra.mxu1 %vm401_vm7, %v1961_v52 }
 0x766   :  { %3694 = vmatpush3.msra.mxu0 %v4299_v10  ;;  %3701 = vmatprep.mubr.msk.f32.mxu0 %vm3942_vm1, %v3941_v2 }
 0x767   :  { %3695 = vmatprep.subr.mxu0 %v3941_v2  ;;  %3705 = vmatpush3.msra.mxu1 %v4250_v0 }
 0x768   :  { %3696 = vmatpush3.msra.mxu0 %v4308_v12  ;;  %3706 = vmatprep.subr.mxu1 %v3941_v2 }
 0x769   :  { %3697 = vmatprep.subr.mxu0 %v3941_v2  ;;  %3707 = vmatpush3.msra.mxu1 %v4260_v3 }
 0x76a   :  { %3698 = vmatpush3.msra.mxu0 %v4317_v13  ;;  %3708 = vmatprep.subr.mxu1 %v3941_v2 }
 0x76b   :  { %3699 = vmatprep.subr.mxu0 %v3941_v2  ;;  %3709 = vmatpush3.msra.mxu1 %v4269_v4 }
 0x76c   :  { %3700 = vmatpush3.msra.mxu0 %v4324_v14  ;;  %3710 = vmatprep.subr.mxu1 %v3941_v2 }
 0x76d   :  { %3702 = vmatmul.mubr.msk.f32.vlgmr.msra.gmra.mxu0 %vm401_vm7, %v1961_v52  ;;  %3715 = vmatprep.subr.mxu0 %v3941_v2 }
 0x76e   :  { %3716 = vmatpush3.msra.mxu0 %v4334_v15  ;;  %3711 = vmatpush3.msra.mxu1 %v4278_v5 }
 0x76f   :  { %3717 = vmatprep.subr.mxu0 %v3941_v2  ;;  %3712 = vmatprep.mubr.msk.f32.mxu1 %vm3942_vm1, %v3941_v2 }
 0x770   :  { %3718 = vmatpush3.msra.mxu0 %v4343_v16  ;;  %3723 = vmatprep.mubr.msk.f32.mxu0 %vm3942_vm1, %v3941_v2 }
 0x771   :  { %3719 = vmatprep.subr.mxu0 %v3941_v2  ;;  %3726 = vmatprep.subr.mxu1 %v3941_v2 }
 0x772   :  { %3720 = vmatpush3.msra.mxu0 %v4350_v17 }
 0x773   :  { %3721 = vmatprep.subr.mxu0 %v3941_v2 }
 0x774   :  { %3722 = vmatpush3.msra.mxu0 %v4357_v18 }
 0x775   :  { %3737 = vmatprep.subr.mxu0 %v3941_v2 }
 0x825   :  { %v2030_v1 = vpop.f32.mrf.mxu0  ;;  %v2100_v54 = vpop.f32.mrf.mxu1 }
 0x826   :  { %v2174_v56 = vadd.f32 %v2030_v1, %v4464_v62  ;;  %v2181_v63 = vadd.f32 %v2100_v54, %v4652_v61 }
 0x827   :  { %v3681_v57 = vpop.f32.mrf.mxu0  ;;  %v3692_v59 = vpop.f32.mrf.mxu1 }
 0x828   :  { %v3215_v60 = vmul.f32 -1.442695, %v2174_v56  ;;  %v3216_v22 = vmul.f32 -1.442695, %v2181_v63 }
 0x82a   :  { %3872 = vpow2.f32 %v3215_v60 }
 0x82b   :  { %3874 = vpow2.f32 %v3216_v22 }
 0x82d   :  { %v2170_v6 = vpop.f32.mrf.mxu0 }
 0x82e   :  { %v2171_v30 = vadd.f32 %v4480_v33, %v2170_v6 }
 0x82f   :  { %v3703_v19 = vpop.f32.mrf.mxu0 }
 0x837   :  { %v3873_v23 = vpop.eup %3872 }
 0x838   :  { %v2178_v55 = vadd.f32 1.0, %v3873_v23  ;;  %v3875_v25 = vpop.eup %3874 }
 0x839   :  { %v2185_v28 = vadd.f32 1.0, %v3875_v25 }
 0x83a   :  { %3876 = vrcp.f32 %v2178_v55 }
 0x83b   :  { %3878 = vrcp.f32 %v2185_v28 }
 0x847   :  { %v3877_v20 = vpop.eup %3876 }
 0x848   :  { %v2188_v31 = vmul.f32 %v3877_v20, %v2171_v30  ;;  %v3879_v38 = vpop.eup %3878 }
 0x849   :  { %v2191_v32 = vsub.f32 1.0, %v3879_v38  ;;  %v2194_v36 = vmul.f32 %v3879_v38, %v1961_v52 }
 0x84a   :  { %v2189_v24 = vadd.f32 %v2188_v31, %v4474_v21 }
 0x84c   :  { %3880 = vtanh.f32 %v2189_v24 }
 0x859   :  { %v3881_v34 = vpop.eup %3880 }
 0x85a   :  { %v2192_v35 = vmul.f32 %v3881_v34, %v2191_v32 }
 0x85c   :  { %v4657_v37 = vadd.f32 %v2194_v36, %v2192_v35 }
 0x85e   :  { %3713 = vmatmul.mubr.msk.f32.vlgmr.msra.gmra.mxu1 %vm401_vm7, %v4657_v37  ;;  %3724 = vmatmul.mubr.msk.f32.vlgmr.msra.gmra.mxu0 %vm401_vm7, %v4657_v37 }
 0x85f   :  { %3727 = vmatpush3.msra.mxu1 %v4299_v10  ;;  %3734 = vmatprep.mubr.msk.f32.mxu1 %vm3942_vm1, %v3941_v2 }
 0x860   :  { %3728 = vmatprep.subr.mxu1 %v3941_v2  ;;  %3738 = vmatpush3.msra.mxu0 %v4250_v0 }
 0x861   :  { %3729 = vmatpush3.msra.mxu1 %v4308_v12  ;;  %3739 = vmatprep.subr.mxu0 %v3941_v2 }
 0x862   :  { %3730 = vmatprep.subr.mxu1 %v3941_v2  ;;  %3740 = vmatpush3.msra.mxu0 %v4260_v3 }
 0x863   :  { %3731 = vmatpush3.msra.mxu1 %v4317_v13  ;;  %3741 = vmatprep.subr.mxu0 %v3941_v2 }
 0x864   :  { %3732 = vmatprep.subr.mxu1 %v3941_v2  ;;  %3742 = vmatpush3.msra.mxu0 %v4269_v4 }
 0x865   :  { %3733 = vmatpush3.msra.mxu1 %v4324_v14  ;;  %3743 = vmatprep.subr.mxu0 %v3941_v2 }
 0x866   :  { %3735 = vmatmul.mubr.msk.f32.vlgmr.msra.gmra.mxu1 %vm401_vm7, %v4657_v37  ;;  %3748 = vmatprep.subr.mxu1 %v3941_v2 }
 0x867   :  { %3749 = vmatpush3.msra.mxu1 %v4334_v15  ;;  %3744 = vmatpush3.msra.mxu0 %v4278_v5 }
 0x868   :  { %3750 = vmatprep.subr.mxu1 %v3941_v2  ;;  %3745 = vmatprep.mubr.msk.f32.mxu0 %vm3942_vm1, %v3941_v2 }
 0x869   :  { %3751 = vmatpush3.msra.mxu1 %v4343_v16  ;;  %3756 = vmatprep.mubr.msk.f32.mxu1 %vm3942_vm1, %v3941_v2 }
 0x86a   :  { %3752 = vmatprep.subr.mxu1 %v3941_v2  ;;  %3759 = vmatprep.subr.mxu0 %v3941_v2 }
 0x86b   :  { %3753 = vmatpush3.msra.mxu1 %v4350_v17 }
 0x86c   :  { %3754 = vmatprep.subr.mxu1 %v3941_v2 }
 0x86d   :  { %3755 = vmatpush3.msra.mxu1 %v4357_v18 }
 0x86e   :  { %3770 = vmatprep.subr.mxu1 %v3941_v2 }
 0x91e   :  { %v2265_v39 = vpop.f32.mrf.mxu1  ;;  %v2335_v40 = vpop.f32.mrf.mxu0 }
 0x91f   :  { %v2410_v42 = vrot.slane %v2265_v39, 4  ;;  %v2420_v11 = vrot.slane %v2335_v40, 4 }
 0x920   :  { %v3714_v43 = vpop.f32.mrf.mxu1  ;;  %v3725_v44 = vpop.f32.mrf.mxu0 }
 0x921   :  { %v2412_v53 = vadd.f32 %v2410_v42, %v4464_v62  ;;  %v2422_v26 = vadd.f32 %v2420_v11, %v4652_v61  ;;  %v2437_v61 = vrot.slane %v4657_v37, 4  ;;  %v2928_v42 = vld [vmem:[%s4860_s24 + $0x10] sm:$0xff]  ;;  %v3936_v43 = vld [vmem:[%s4849_s23 + $0x18] sm:$0xff]  ;;  %v2922_v44 = vsel %vm189_vm4, %v4487_v46, %v4530_v27  ;;  %v2926_v11 = vld [vmem:[%s4860_s24] sm:$0xff] }
 0x922   :  { %v3938_v46 = vld [vmem:[%s4849_s23 + $0x8] sm:$0xff]  ;;  %v3939_v27 = vld [vmem:[%s4849_s23] sm:$0xff] }
 0x923   :  { %v3220_v45 = vmul.f32 -1.442695, %v2412_v53  ;;  %v3221_v48 = vmul.f32 -1.442695, %v2422_v26  ;;  %v2927_v53 = vld [vmem:[%s4860_s24 + $0x8] sm:$0xff] }
 0x925   :  { %3882 = vpow2.f32 %v3220_v45  ;;  %v3937_v45 = vld [vmem:[%s4849_s23 + $0x10] sm:$0xff] }
 0x926   :  { %v2405_v41 = vpop.f32.mrf.mxu1  ;;  %3884 = vpow2.f32 %v3221_v48 }
 0x927   :  { %v2406_v54 = vadd.f32 %v4480_v33, %v2405_v41  ;;  %v2923_v41 = vsel %vm189_vm4, %v4570_v7, %v4613_v50  ;;  %v3232_v50 = vld [vmem:[%s4861_s25] ss:$0 sm:$0xff] }
 0x928   :  { %v3736_v47 = vpop.f32.mrf.mxu1 }
 0x929   :  { %v2430_v57 = vrot.slane %v2406_v54, 4 }
 0x932   :  { %v3883_v49 = vpop.eup %3882 }
 0x933   :  { %v2416_v52 = vadd.f32 1.0, %v3883_v49  ;;  %v3885_v1 = vpop.eup %3884 }
 0x934   :  { %v2426_v56 = vadd.f32 1.0, %v3885_v1 }
 0x935   :  { %3886 = vrcp.f32 %v2416_v52 }
 0x936   :  { %3888 = vrcp.f32 %v2426_v56 }
 0x942   :  { %v3887_v59 = vpop.eup %3886 }
 0x943   :  { %v2432_v62 = vmul.f32 %v3887_v59, %v2430_v57  ;;  %v3889_v63 = vpop.eup %3888 }
 0x944   :  { %v2435_v6 = vsub.f32 1.0, %v3889_v63  ;;  %v2439_v23 = vmul.f32 %v3889_v63, %v2437_v61 }
 0x945   :  { %v2433_v60 = vadd.f32 %v2432_v62, %v4474_v21 }
 0x947   :  { %3890 = vtanh.f32 %v2433_v60 }
 0x954   :  { %v3891_v19 = vpop.eup %3890 }
 0x955   :  { %v2436_v22 = vmul.f32 %v3891_v19, %v2435_v6 }
 0x957   :  { %v4700_v55 = vadd.f32 %v2439_v23, %v2436_v22 }
 0x959   :  { %v2442_v25 = vrot.slane %v4700_v55, 4  ;;  %v2924_v26 = vsel %vm189_vm4, %v4657_v37, %v4700_v55 }
 0x95b   :  { %3746 = vmatmul.mubr.msk.f32.vlgmr.msra.gmra.mxu0 %vm401_vm7, %v2442_v25  ;;  %3757 = vmatmul.mubr.msk.f32.vlgmr.msra.gmra.mxu1 %vm401_vm7, %v2442_v25 }
 0x95c   :  { %3760 = vmatpush3.msra.mxu0 %v4299_v10  ;;  %3767 = vmatprep.mubr.msk.f32.mxu0 %vm3942_vm1, %v3941_v2 }
 0x95d   :  { %3761 = vmatprep.subr.mxu0 %v3941_v2  ;;  %3771 = vmatpush3.msra.mxu1 %v4250_v0  ;;  %v2929_v0 = vld [vmem:[%s4860_s24 + $0x18] sm:$0xff] }
 0x95e   :  { %3762 = vmatpush3.msra.mxu0 %v4308_v12  ;;  %3772 = vmatprep.subr.mxu1 %v3941_v2 }
 0x95f   :  { %3763 = vmatprep.subr.mxu0 %v3941_v2  ;;  %3773 = vmatpush3.msra.mxu1 %v4260_v3 }
 0x960   :  { %3764 = vmatpush3.msra.mxu0 %v4317_v13  ;;  %3774 = vmatprep.subr.mxu1 %v3941_v2 }
 0x961   :  { %3765 = vmatprep.subr.mxu0 %v3941_v2  ;;  %3775 = vmatpush3.msra.mxu1 %v4269_v4 }
 0x962   :  { %3766 = vmatpush3.msra.mxu0 %v4324_v14  ;;  %3776 = vmatprep.subr.mxu1 %v3941_v2 }
 0x963   :  { %3768 = vmatmul.mubr.msk.f32.vlgmr.msra.gmra.mxu0 %vm401_vm7, %v2442_v25  ;;  %3781 = vmatprep.subr.mxu0 %v3941_v2 }
 0x964   :  { %3782 = vmatpush3.msra.mxu0 %v4334_v15  ;;  %3777 = vmatpush3.msra.mxu1 %v4278_v5 }
 0x965   :  { %3783 = vmatprep.subr.mxu0 %v3941_v2  ;;  %3778 = vmatprep.mubr.msk.f32.mxu1 %vm3942_vm1, %v3941_v2 }
 0x966   :  { %3784 = vmatpush3.msra.mxu0 %v4343_v16  ;;  %3789 = vmatprep.mubr.msk.f32.mxu0 %vm3942_vm1, %v3941_v2 }
 0x967   :  { %3785 = vmatprep.subr.mxu0 %v3941_v2  ;;  %3792 = vmatprep.subr.mxu1 %v3941_v2 }
 0x968   :  { %3786 = vmatpush3.msra.mxu0 %v4350_v17 }
 0x969   :  { %3787 = vmatprep.subr.mxu0 %v3941_v2 }
 0x96a   :  { %3788 = vmatpush3.msra.mxu0 %v4357_v18 }
 0x96b   :  { %3803 = vmatprep.subr.mxu0 %v2929_v0 }
 0xa1b   :  { %v2511_v3 = vpop.f32.mrf.mxu0  ;;  %v2581_v4 = vpop.f32.mrf.mxu1 }
 0xa1c   :  { %v2655_v5 = vadd.f32 %v2511_v3, %v4459_v58  ;;  %v2662_v14 = vadd.f32 %v2581_v4, %v4379_v29 }
 0xa1d   :  { %v3747_v10 = vpop.f32.mrf.mxu0  ;;  %v3758_v12 = vpop.f32.mrf.mxu1 }
 0xa1e   :  { %v3225_v13 = vmul.f32 -1.442695, %v2655_v5  ;;  %v3226_v17 = vmul.f32 -1.442695, %v2662_v14 }
 0xa20   :  { %3892 = vpow2.f32 %v3225_v13 }
 0xa21   :  { %3894 = vpow2.f32 %v3226_v17 }
 0xa23   :  { %v2651_v15 = vpop.f32.mrf.mxu0 }
 0xa24   :  { %v2652_v20 = vadd.f32 %v4480_v33, %v2651_v15 }
 0xa25   :  { %v3769_v16 = vpop.f32.mrf.mxu0 }
 0xa2d   :  { %v3893_v18 = vpop.eup %3892 }
 0xa2e   :  { %v2659_v21 = vadd.f32 1.0, %v3893_v18  ;;  %v3895_v28 = vpop.eup %3894 }
 0xa2f   :  { %v2666_v30 = vadd.f32 1.0, %v3895_v28 }
 0xa30   :  { %3896 = vrcp.f32 %v2659_v21 }
 0xa31   :  { %3898 = vrcp.f32 %v2666_v30 }
 0xa3d   :  { %v3897_v31 = vpop.eup %3896 }
 0xa3e   :  { %v2669_v24 = vmul.f32 %v3897_v31, %v2652_v20  ;;  %v3899_v32 = vpop.eup %3898  ;;  %v3086_v31 = vld [vmem:[%s4862_s4] sm:$0xff] }
 0xa3f   :  { %v2672_v34 = vsub.f32 1.0, %v3899_v32  ;;  %v2675_v39 = vmul.f32 %v3899_v32, %v2442_v25 }
 0xa40   :  { %v2670_v38 = vadd.f32 %v2669_v24, %v4468_v8  ;;  %v3088_v24 = vld [vmem:[%s4862_s4 + $0x10] sm:$0xff] }
 0xa42   :  { %3900 = vtanh.f32 %v2670_v38 }
 0xa4f   :  { %v3901_v35 = vpop.eup %3900 }
 0xa50   :  { %v2673_v36 = vmul.f32 %v3901_v35, %v2672_v34 }
 0xa52   :  { %v4742_v40 = vadd.f32 %v2675_v39, %v2673_v36 }
 0xa54   :  { %3779 = vmatmul.mubr.msk.f32.vlgmr.msra.gmra.mxu1 %vm401_vm7, %v4742_v40  ;;  %3790 = vmatmul.mubr.msk.f32.vlgmr.msra.gmra.mxu0 %vm401_vm7, %v4742_v40  ;;  %v2918_v14 = vrot.slane %v4742_v40, 4 }
 0xa55   :  { %3793 = vmatpush3.msra.mxu1 %v3936_v43  ;;  %3804 = vmatpush3.msra.mxu0 %v2929_v0 }
 0xa56   :  { %3794 = vmatprep.subr.mxu1 %v3941_v2  ;;  %3805 = vmatprep.subr.mxu0 %v2928_v42 }
 0xa57   :  { %3811 = vmatprep.mubr.msk.f32.mxu0 %vm401_vm7, %v2922_v44  ;;  %3795 = vmatpush3.msra.mxu1 %v3937_v45 }
 0xa58   :  { %3806 = vmatpush3.msra.mxu0 %v2928_v42  ;;  %3796 = vmatprep.subr.mxu1 %v3941_v2 }
 0xa59   :  { %3807 = vmatprep.subr.mxu0 %v2927_v53  ;;  %3797 = vmatpush3.msra.mxu1 %v3938_v46 }
 0xa5a   :  { %3808 = vmatpush3.msra.mxu0 %v2927_v53  ;;  %3798 = vmatprep.subr.mxu1 %v3941_v2 }
 0xa5b   :  { %3809 = vmatprep.subr.mxu0 %v2926_v11  ;;  %3799 = vmatpush3.msra.mxu1 %v3939_v27 }
 0xa5c   :  { %3800 = vmatprep.mubr.msk.f32.mxu1 %vm3942_vm1, %v3941_v2  ;;  %3810 = vmatpush3.msra.mxu0 %v2926_v11 }
 0xa5d   :  { %3801 = vmatmul.mubr.msk.f32.vlgmr.msra.gmra.mxu1 %vm401_vm7, %v4742_v40  ;;  %3812 = vmatmul.mubr.msk.f32.vlgmr.msra.gmra.mxu0 %vm401_vm7, %v2923_v41 }
 0xa5e   :  { %3814 = vmatprep.mubr.msk.f32.mxu0 %vm401_vm7, %v2924_v26 }
 0xb14   :  { %v2746_v47 = vpop.f32.mrf.mxu1  ;;  %v2816_v48 = vpop.f32.mrf.mxu0 }
 0xb15   :  { %v2891_v49 = vrot.slane %v2746_v47, 4  ;;  %v2901_v7 = vrot.slane %v2816_v48, 4 }
 0xb16   :  { %v3780_v2 = vpop.f32.mrf.mxu1  ;;  %v3791_v52 = vpop.f32.mrf.mxu0 }
 0xb17   :  { %v2893_v1 = vadd.f32 %v2891_v49, %v4459_v58  ;;  %v2903_v56 = vadd.f32 %v2901_v7, %v4379_v29  ;;  %v3087_v7 = vld [vmem:[%s4862_s4 + $0x8] sm:$0xff] }
 0xb19   :  { %v3230_v54 = vmul.f32 -1.442695, %v2893_v1  ;;  %v3231_v6 = vmul.f32 -1.442695, %v2903_v56 }
 0xb1b   :  { %3902 = vpow2.f32 %v3230_v54  ;;  %v3089_v54 = vld [vmem:[%s4862_s4 + $0x18] sm:$0xff] }
 0xb1d   :  { %v2886_v57 = vpop.f32.mrf.mxu1  ;;  %v3813_v37 = vpop.f32.mrf.mxu0 }
 0xb1e   :  { %v3021_v59 = vadd.f32 %v3813_v37, %v3232_v50  ;;  %v2887_v25 = vadd.f32 %v4480_v33, %v2886_v57 }
 0xb1f   :  { %v3802_v62 = vpop.f32.mrf.mxu1  ;;  %v3015_v60 = vpop.f32.mrf.mxu0 }
 0xb20   :  { %3904 = vtanh.f32 %v3021_v59  ;;  %v3016_v63 = vadd.f32 %v3232_v50, %v3015_v60  ;;  %v2911_v3 = vrot.slane %v2887_v25, 4 }
 0xb22   :  { %3906 = vtanh.f32 %v3016_v63 }
 0xb23   :  { %3908 = vpow2.f32 %v3231_v6 }
 0xb28   :  { %v3903_v58 = vpop.eup %3902 }
 0xb29   :  { %v2897_v61 = vadd.f32 1.0, %v3903_v58 }
 0xb2b   :  { %3910 = vrcp.f32 %v2897_v61 }
 0xb2d   :  { %v3905_v19 = vpop.eup %3904 }
 0xb2e   :  { %v3041_v22 = vsel %vm299_vm8, %v3905_v19, -inf }
 0xb2f   :  { %v3907_v23 = vpop.eup %3906  ;;  %3042 = vmax.xlane.f32.xlu1 %v3041_v22 }
 0xb30   :  { %v3038_v29 = vsel %vm299_vm8, %v3907_v23, -inf  ;;  %v3909_v55 = vpop.eup %3908 }
 0xb31   :  { %3039 = vmax.xlane.f32.xlu0 %v3038_v29  ;;  %v2907_v0 = vadd.f32 1.0, %v3909_v55 }
 0xb33   :  { %3912 = vrcp.f32 %v2907_v0 }
 0xb38   :  { %v3911_v4 = vpop.eup %3910 }
 0xb39   :  { %v2913_v5 = vmul.f32 %v3911_v4, %v2911_v3 }
 0xb3b   :  { %v2914_v10 = vadd.f32 %v2913_v5, %v4468_v8 }
 0xb3d   :  { %3914 = vtanh.f32 %v2914_v10 }
 0xb40   :  { %v3913_v12 = vpop.eup %3912 }
 0xb41   :  { %v2916_v13 = vsub.f32 1.0, %v3913_v12  ;;  %v2920_v17 = vmul.f32 %v3913_v12, %v2918_v14 }
 0xb4a   :  { %v3915_v15 = vpop.eup %3914 }
 0xb4b   :  { %v2917_v16 = vmul.f32 %v3915_v15, %v2916_v13 }
 0xb4d   :  { %v2921_v18 = vadd.f32 %v2920_v17, %v2917_v16 }
 0xb4f   :  { %v2925_v21 = vsel %vm189_vm4, %v4742_v40, %v2921_v18  ;;  %vm3146_vm4 = vcmask 8192  }
 0xb50   :  { %3815 = vmatmul.mubr.msk.f32.gmra.mxu0 %vm401_vm7, %v2925_v21 }
 0xbb8   :  { %v3043_v38 = vpop.xlane.xlu1 %3042 }
 0xbb9   :  { %v3051_v35 = vsub.f32 %v3905_v19, %v3043_v38 }
 0xbba   :  { %v3040_v33 = vpop.xlane.xlu0 %3039 }
 0xbbb   :  { %v3050_v28 = vsub.f32 %v3907_v23, %v3040_v33  ;;  %v3056_v40 = vmul.f32 1.442695, %v3051_v35 }
 0xbbd   :  { %v3054_v30 = vmul.f32 1.442695, %v3050_v28 }
 0xbbf   :  { %3916 = vpow2.f32 %v3054_v30 }
 0xbcc   :  { %v3917_v20 = vpop.eup %3916 }
 0xbcd   :  { %v3062_v8 = vsel %vm299_vm8, %v3917_v20, 0.0 }
 0xbce   :  { %3063 = vadd.xlane.f32.xlu1 %v3062_v8 }
 0xbdf   :  { %3091 = vperm.xlu1 %3827, %v3086_v31  }
 0xbe3   :  { %3097 = vperm.xlu1 %3827, %v3088_v24  }
 0xc10   :  { %v3816_v32 = vpop.f32.mrf.mxu0 }
 0xc11   :  { %v3031_v36 = vadd.f32 %v3816_v32, %v3232_v50 }
 0xc12   :  { %v3025_v34 = vpop.f32.mrf.mxu0 }
 0xc13   :  { %v3026_v39 = vadd.f32 %v3232_v50, %v3025_v34 }
 0xc15   :  { %3918 = vtanh.f32 %v3026_v39 }
 0xc16   :  { %3920 = vtanh.f32 %v3031_v36 }
 0xc17   :  { %3922 = vpow2.f32 %v3056_v40 }
 0xc22   :  { %v3919_v42 = vpop.eup %3918 }
 0xc23   :  { %v3044_v43 = vsel %vm299_vm8, %v3919_v42, -inf  ;;  %v3921_v44 = vpop.eup %3920 }
 0xc24   :  { %3045 = vmax.xlane.f32.xlu0 %v3044_v43  ;;  %v3047_v53 = vsel %vm299_vm8, %v3921_v44, -inf  ;;  %v3923_v45 = vpop.eup %3922 }
 0xc25   :  { %v3065_v11 = vsel %vm299_vm8, %v3923_v45, 0.0 }
 0xc28   :  { %3048 = vmax.xlane.f32.xlu0 %v3047_v53 }
 0xc2c   :  { %3066 = vadd.xlane.f32.xlu0 %v3065_v11 }
 0xc57   :  { %v3064_v50 = vpop.xlane.xlu1 %3063 }
 0xc5b   :  { %v3092_v37 = vpop.permute.xlu1 %3091 }
 0xc5c   :  { %vm3102_vm15 = vcmp.eq.s32.totalorder %v4108_v9, %v3092_v37 }
 0xc5f   :  { %v3098_v6 = vpop.permute.xlu1 %3097 }
 0xc60   :  { %vm3104_vm1 = vcmp.eq.s32.totalorder %v4108_v9, %v3098_v6 }
 0xcad   :  { %v3046_v46 = vpop.xlane.xlu0 %3045 }
 0xcae   :  { %v3052_v27 = vsub.f32 %v3919_v42, %v3046_v46 }
 0xcb0   :  { %v3058_v41 = vmul.f32 1.442695, %v3052_v27 }
 0xcb1   :  { %v3049_v26 = vpop.xlane.xlu0 %3048 }
 0xcb2   :  { %3924 = vpow2.f32 %v3058_v41  ;;  %v3053_v47 = vsub.f32 %v3921_v44, %v3049_v26 }
 0xcb4   :  { %v3060_v48 = vmul.f32 1.442695, %v3053_v47 }
 0xcb5   :  { %v3067_v63 = vpop.xlane.xlu0 %3066 }
 0xcb6   :  { %3926 = vpow2.f32 %v3060_v48 }
 0xcb7   :  { %3928 = vlog2.f32 %v3064_v50 }
 0xcb8   :  { %3930 = vlog2.f32 %v3067_v63 }
 0xcbf   :  { %v3925_v49 = vpop.eup %3924 }
 0xcc0   :  { %v3068_v2 = vsel %vm299_vm8, %v3925_v49, 0.0 }
 0xcc1   :  { %3069 = vadd.xlane.f32.xlu1 %v3068_v2 }
 0xcc3   :  { %v3927_v52 = vpop.eup %3926 }
 0xcc4   :  { %v3071_v1 = vsel %vm299_vm8, %v3927_v52, 0.0  ;;  %v3929_v56 = vpop.eup %3928 }
 0xcc5   :  { %3072 = vadd.xlane.f32.xlu0 %v3071_v1  ;;  %v3075_v57 = vmul.f32 0.6931472, %v3929_v56  ;;  %v3931_v19 = vpop.eup %3930 }
 0xcc6   :  { %v3077_v22 = vmul.f32 0.6931472, %v3931_v19 }
 0xcc7   :  { %v3082_v59 = vsub.f32 %v3050_v28, %v3075_v57 }
 0xcc8   :  { %v3083_v29 = vsub.f32 %v3051_v35, %v3077_v22 }
 0xcc9   :  { %v3106_v62 = vsel %vm3102_vm15, %v3082_v59, 0.0 }
 0xcca   :  { %v3110_v60 = vsel %vm299_vm8, %v3106_v62, 0.0 }
 0xcd2   :  { %3100 = vperm.xlu1 %3827, %v3089_v54  }
 0xcdb   :  { %3094 = vperm.xlu0 %3826, %v3087_v7  }
 0xcfa   :  { %3111 = vadd.xlane.f32.xlu0 %v3110_v60 }
 0xd4a   :  { %v3070_v58 = vpop.xlane.xlu1 %3069 }
 0xd4b   :  { %3932 = vlog2.f32 %v3070_v58 }
 0xd4e   :  { %v3073_v61 = vpop.xlane.xlu0 %3072  ;;  %v3101_v10 = vpop.permute.xlu1 %3100 }
 0xd4f   :  { %3934 = vlog2.f32 %v3073_v61  ;;  %vm3105_vm2 = vcmp.eq.s32.totalorder %v4108_v9, %v3101_v10 }
 0xd56   :  { %v3095_v23 = vpop.permute.xlu0 %3094 }
 0xd57   :  { %vm3103_vm0 = vcmp.eq.s32.totalorder %v4108_v9, %v3095_v23 }
 0xd58   :  { %v3933_v55 = vpop.eup %3932  ;;  %v3107_v25 = vsel %vm3103_vm0, %v3083_v29, 0.0 }
 0xd59   :  { %v3079_v0 = vmul.f32 0.6931472, %v3933_v55  ;;  %v3113_v3 = vsel %vm299_vm8, %v3107_v25, 0.0 }
 0xd5a   :  { %3114 = vadd.xlane.f32.xlu1 %v3113_v3 }
 0xd5b   :  { %v3084_v4 = vsub.f32 %v3052_v27, %v3079_v0 }
 0xd5c   :  { %v3935_v5 = vpop.eup %3934 }
 0xd5d   :  { %v3081_v12 = vmul.f32 0.6931472, %v3935_v5  ;;  %v3108_v13 = vsel %vm3104_vm1, %v3084_v4, 0.0 }
 0xd5e   :  { %666 = vadd.xlane.f32.xlu1 %v4452_v51  ;;  %v3116_v14 = vsel %vm299_vm8, %v3108_v13, 0.0 }
 0xd5f   :  { %3117 = vadd.xlane.f32.xlu0 %v3116_v14  ;;  %v3085_v15 = vsub.f32 %v3053_v47, %v3081_v12 }
 0xd61   :  { %v3109_v16 = vsel %vm3105_vm2, %v3085_v15, 0.0 }
 0xd62   :  { %v3119_v17 = vsel %vm299_vm8, %v3109_v16, 0.0 }
 0xd63   :  { %3120 = vadd.xlane.f32.xlu0 %v3119_v17 }
 0xd83   :  { %v3112_v21 = vpop.xlane.xlu0 %3111 }
 0xd84   :  { %v3123_v51 = vsel %vm3122_vm3, %v3112_v21, 0.0 }
 0xde3   :  { %v3115_v18 = vpop.xlane.xlu1 %3114 }
 0xde4   :  { %v3124_v33 = vsel %vm3122_vm3, %v3115_v18, 0.0 }
 0xde5   :  { %v3125_v31 = vadd.f32 %v3124_v33, %v3123_v51 }
 0xde7   :  { %v667_v28 = vpop.xlane.xlu1 %666 }
 0xde8   :  { %v668_v30 = vrot.slane %v667_v28, 4  ;;  %v3118_v20 = vpop.xlane.xlu0 %3117 }
 0xde9   :  { %v3126_v8 = vsel %vm3122_vm3, %v3118_v20, 0.0 }
 0xdea   :  { %v669_v24 = vadd.f32 %v668_v30, %v667_v28  ;;  %v3127_v9 = vadd.f32 %v3126_v8, %v3125_v31 }
 0xdec   :  { %v670_v38 = vrot.slane %v669_v24, 2  ;;  %v3121_v32 = vpop.xlane.xlu0 %3120 }
 0xded   :  { %v3128_v34 = vsel %vm3122_vm3, %v3121_v32, 0.0 }
 0xdee   :  { %v3129_v35 = vadd.f32 %v3128_v34, %v3127_v9  ;;  %v671_v36 = vadd.f32 %v670_v38, %v669_v24 }
 0xdf0   :  { %3130 = vadd.xlane.f32.xlu0 %v3129_v35  ;;  %v672_v39 = vrot.slane %v671_v36, 1 }
 0xdf2   :  { %v673_v40 = vadd.f32 %v672_v39, %v671_v36 }
 0xdf4   :  { %3817 = vpush %v673_v40 }
 0xe25   :  { %s3818_s4 = spop %3817 }
 0xe26   :  { %s677_s26 = smul.f32 0.25, %s3818_s4 }
 0xe28   :  { %v3143_v27 = vstv %s677_s26 }
 0xe79   :  { %v3131_v42 = vpop.xlane.xlu0 %3130 }
 0xe7a   :  { %v3132_v43 = vrot.slane %v3131_v42, 4 }
 0xe7c   :  { %v3133_v44 = vadd.f32 %v3132_v43, %v3131_v42 }
 0xe7e   :  { %v3134_v53 = vrot.slane %v3133_v44, 2 }
 0xe80   :  { %v3135_v45 = vadd.f32 %v3134_v53, %v3133_v44 }
 0xe82   :  { %v3136_v11 = vrot.slane %v3135_v45, 1 }
 0xe84   :  { %v3137_v46 = vadd.f32 %v3136_v11, %v3135_v45 }
 0xe86   :  { %3819 = vpush %v3137_v46 }
 0xeb7   :  { %s3820_s17 = spop %3819 }
 0xeb8   :  { %s3141_s19 = smul.f32 0.03125, %s3820_s17 }
 0xeba   :  { %s3142_s20 = ssub.f32 0.0, %s3141_s19 }
 0xebc   :  { %v3144_v41 = vstv %s3142_s20 }
 0xebd   :  { %v3145_v26 = vsel %vm3122_vm3, %v3143_v27, %v3144_v41 }
 0xebe   :  { %3147 = vst.msk [vmem:[%s4863_s27] sm:$0x1] %vm3146_vm4, %v3145_v26 }

</bundles_post_ra>
